<compile_context>
chip_gen: v7x
topology: tpu7x:2x2x1
jax: 0.10.0
libtpu: 0.0.40
codegen_flags: <defaults>
</compile_context>

<pallas_src>
import jax
import jax.numpy as jnp
from jax.experimental import pallas as pl
from jax.experimental.pallas import tpu as pltpu


# ------------------------------ fused kernel --------------------------------

def block_kernel(x_ref, w1a_ref, w1b_ref, b1_ref, w2a_ref, w2b_ref, b2_ref,
                 o_ref, xp_ref):
    """B_TILE batch elems: x_ref/o_ref (B, H, L); xp_ref (B, H+2, L) halo scratch."""
    B, H, L = x_ref.shape
    M = B * H
    f32 = jnp.float32
    bf16 = jnp.bfloat16

    x = x_ref[...]                       # (B, H, L) f32, read exactly once
    x2d = x.reshape(M, L)

    # Zero the per-element 1-row halos.  Done every grid step on purpose: with
    # megacore ("parallel") sharding each core has its own scratch, so gating
    # this on program_id == 0 would leave one core's halo uninitialized.
    xp_ref[:, 0:1, :] = jnp.zeros((B, 1, L), f32)
    xp_ref[:, H + 1:H + 2, :] = jnp.zeros((B, 1, L), f32)

    def hconv(w_ref):
        # 3-tap conv along H as ONE MXU matmul: LHS = [X(-1) | X(0) | X(+1)]
        # (M, 3L) built from shifted views of the halo scratch, RHS = (3L, L)
        # K-stacked block-diagonal taps.  Tap accumulation happens inside the
        # MXU (no result-FIFO pops + VPU adds between taps).
        lhs = jnp.concatenate(
            [xp_ref[:, pl.ds(k, H), :].reshape(M, L) for k in range(3)],
            axis=1)
        return jnp.dot(lhs.astype(bf16), w_ref[...],
                       preferred_element_type=f32)           # (M, L) f32

    # ---- conv1a : (3,1) along H ----
    xp_ref[:, pl.ds(1, H), :] = x
    t1 = hconv(w1a_ref)

    # ---- conv1b : (1,3) along W (block-banded matmul), bn1 folded, relu ----
    t2 = jnp.dot(t1.astype(bf16), w1b_ref[...],
                 preferred_element_type=f32) + b1_ref[...]
    t2 = jnp.maximum(t2, 0.0)

    # ---- conv2a : (3,1) along H ----
    xp_ref[:, pl.ds(1, H), :] = t2.reshape(B, H, L)
    t3 = hconv(w2a_ref)

    # ---- conv2b : (1,3) along W, bn2 folded, + residual, relu (all f32) ----
    y = (jnp.dot(t3.astype(bf16), w2b_ref[...], preferred_element_type=f32)
         + b2_ref[...] + x2d)
    o_ref[...] = jnp.maximum(y, 0.0).reshape(B, H, L)


# ------------------------------ host wrappers ---------------------------------

def basic_block_asymmetric_packed(x_p, packed, b_tile=16):
    """Fused block on packed (N, H, W*C) activations.

    Chain this function across consecutive blocks of a network and convert
    NCHW <-> packed only once at the network boundary (each conversion is a
    full extra HBM round trip).
    """
    w1a, w1b, b1, w2a, w2b, b2 = packed
    N, H, L = x_p.shape

    # Handle N % b_tile != 0 by zero-padding the batch (padded elements are
    # independent of the real ones and are sliced off afterwards).
    n_pad = (-N) % b_tile
    if n_pad:
        x_p = jnp.concatenate(
            [x_p, jnp.zeros((n_pad, H, L), x_p.dtype)], axis=0)
    n_total = N + n_pad

    out_p = pl.pallas_call(
        block_kernel,
        out_shape=jax.ShapeDtypeStruct((n_total, H, L), jnp.float32),
        grid_spec=pltpu.PrefetchScalarGridSpec(
            num_scalar_prefetch=0,
            grid=(n_total // b_tile,),
            in_specs=[
                pl.BlockSpec((b_tile, H, L), lambda n: (n, 0, 0)),  # x (packed)
                pl.BlockSpec((3 * L, L), lambda n: (0, 0)),  # w1a taps, K-stacked, bf16
                pl.BlockSpec((L, L),     lambda n: (0, 0)),  # w1b banded (bn1 folded), bf16
                pl.BlockSpec((1, L),     lambda n: (0, 0)),  # b1 tiled, f32
                pl.BlockSpec((3 * L, L), lambda n: (0, 0)),  # w2a taps, K-stacked, bf16
                pl.BlockSpec((L, L),     lambda n: (0, 0)),  # w2b banded (bn2 folded), bf16
                pl.BlockSpec((1, L),     lambda n: (0, 0)),  # b2 tiled, f32
            ],
            out_specs=pl.BlockSpec((b_tile, H, L), lambda n: (n, 0, 0)),
            scratch_shapes=[pltpu.VMEM((b_tile, H + 2, L), jnp.float32)],
        ),
        compiler_params=pltpu.CompilerParams(
            dimension_semantics=("parallel",)),
    )(x_p, w1a, w1b, b1, w2a, w2b, b2)

    return out_p[:N] if n_pad else out_p


def basic_block_asymmetric(x_nchw, packed, b_tile=16):
    """NCHW wrapper: single layout conversion at the edge, then the fused kernel."""
    N, C, H, W = x_nchw.shape
    L = W * C
    x_p = jnp.transpose(x_nchw, (0, 2, 3, 1)).reshape(N, H, L).astype(jnp.float32)
    out_p = basic_block_asymmetric_packed(x_p, packed, b_tile=b_tile)
    return jnp.transpose(out_p.reshape(N, H, W, C), (0, 3, 1, 2))     # back to NCHW


def pack_params(w1a_t, w1b_t, w2a_t, w2b_t, s1, b1, s2, b2, W):
    """Pack PyTorch OIHW weights + folded-BN scale/bias into packed-layout matrices.

    H-conv weights are K-stacked (3*W*C, W*C); W-conv weights are block-banded
    (W*C, W*C) with the BN scale folded into their columns.  All matmul
    operands are bf16 (MXU-native); biases stay f32.
    """
    f32, bf16 = jnp.float32, jnp.bfloat16

    def taps_h(wt):   # (Cout, Cin, 3, 1) -> (3, Cin, Cout)
        return jnp.transpose(wt[:, :, :, 0], (2, 1, 0)).astype(f32)

    def taps_w(wt):   # (Cout, Cin, 1, 3) -> (3, Cin, Cout)
        return jnp.transpose(wt[:, :, 0, :], (2, 1, 0)).astype(f32)

    def hconv_mat(taps):
        # Rows [k*L:(k+1)*L] = block-diagonal matrix of tap k (same w position
        # in and out).  Matches the kernel's LHS concat order [shift0|shift1|shift2].
        return jnp.concatenate(
            [jnp.kron(jnp.eye(W, dtype=f32), taps[k]) for k in range(3)],
            axis=0).astype(bf16)

    def wconv_mat(taps, scale):
        # Block-banded: tap k couples input w_out + k - 1 -> output w_out.
        m = sum(jnp.kron(jnp.eye(W, k=1 - k, dtype=f32), taps[k]) for k in range(3))
        # Fold BN scale (per output channel) into the columns, then cast.
        return (m * jnp.tile(scale.astype(f32), W)[None, :]).astype(bf16)

    w1a_p = hconv_mat(taps_h(w1a_t))
    w2a_p = hconv_mat(taps_h(w2a_t))
    w1b_p = wconv_mat(taps_w(w1b_t), s1)
    w2b_p = wconv_mat(taps_w(w2b_t), s2)
    b1_p = jnp.tile(b1.astype(f32), W).reshape(1, -1)
    b2_p = jnp.tile(b2.astype(f32), W).reshape(1, -1)
    return w1a_p, w1b_p, b1_p, w2a_p, w2b_p, b2_p


# ------------------------------ reference (JAX) ------------------------------

def _conv_ref(x, w, pad):
    return jax.lax.conv_general_dilated(
        x, w, window_strides=(1, 1),
        padding=((pad[0], pad[0]), (pad[1], pad[1])),
        dimension_numbers=('NCHW', 'OIHW', 'NCHW'),
        precision=jax.lax.Precision.HIGHEST)


def reference_block(x, torch_weights, bn1, bn2):
    w1a, w1b, w2a, w2b = torch_weights
    (s1, b1), (s2, b2) = bn1, bn2
    o = _conv_ref(x, w1a, (1, 0))
    o = _conv_ref(o, w1b, (0, 1))
    o = o * s1.reshape(1, -1, 1, 1) + b1.reshape(1, -1, 1, 1)
    o = jnp.maximum(o, 0.0)
    o = _conv_ref(o, w2a, (1, 0))
    o = _conv_ref(o, w2b, (0, 1))
    o = o * s2.reshape(1, -1, 1, 1) + b2.reshape(1, -1, 1, 1)
    o = o + x
    return jnp.maximum(o, 0.0)


# ---------------------------------- main --------------------------------------

if __name__ == "__main__":
    key = jax.random.PRNGKey(0)
    N, C, H, W = 24, 8, 16, 16        # inplanes = planes = 8 -> W*C = 128 (lane dense)
    planes = C
    B_TILE = 16                       # M = B_TILE*H = 256; grid = 2 (exercises padding
                                      # N=24 -> 32, and keeps both v7x TCs busy)

    keys = jax.random.split(key, 9)
    x = jax.random.normal(keys[0], (N, C, H, W), jnp.float32)

    # PyTorch-shaped conv weights (OIHW), bias=False
    w1a_t = jax.random.normal(keys[1], (planes, C, 3, 1), jnp.float32) * 0.1
    w1b_t = jax.random.normal(keys[2], (planes, planes, 1, 3), jnp.float32) * 0.1
    w2a_t = jax.random.normal(keys[3], (planes, planes, 3, 1), jnp.float32) * 0.1
    w2b_t = jax.random.normal(keys[4], (planes, planes, 1, 3), jnp.float32) * 0.1

    # Frozen BatchNorm (eval form): fold gamma/beta/running stats to scale/bias.
    eps = 1e-5
    gamma1 = jax.random.normal(keys[5], (planes,), jnp.float32) * 0.1 + 1.0
    beta1 = jax.random.normal(keys[6], (planes,), jnp.float32) * 0.1
    rmean1 = jax.random.normal(keys[7], (planes,), jnp.float32) * 0.1
    rvar1 = jnp.abs(jax.random.normal(keys[8], (planes,), jnp.float32)) + 0.5
    gamma2, beta2, rmean2, rvar2 = gamma1[::-1], beta1[::-1], rmean1[::-1], rvar1[::-1]

    s1 = gamma1 / jnp.sqrt(rvar1 + eps)
    b1 = beta1 - rmean1 * s1
    s2 = gamma2 / jnp.sqrt(rvar2 + eps)
    b2 = beta2 - rmean2 * s2

    packed = pack_params(w1a_t, w1b_t, w2a_t, w2b_t, s1, b1, s2, b2, W)

    fwd = jax.jit(basic_block_asymmetric, static_argnames=("b_tile",))
    out = fwd(x, packed, b_tile=B_TILE)
    out = jax.block_until_ready(out)

    ref = reference_block(x, (w1a_t, w1b_t, w2a_t, w2b_t), (s1, b1), (s2, b2))
    assert out.shape == (N, planes, H, W)
    err = float(jnp.max(jnp.abs(out - ref)))
    # bf16 MXU operands -> tolerance loosened vs. the pure-f32 version.
    assert jnp.allclose(out, ref, atol=5e-2, rtol=5e-2), f"max abs err {err}"

    print("KERNEL_OK")
</pallas_src>

<mosaic_0001>
module attributes {stable_mosaic.version = 11 : i64} {
  func.func @block_kernel(%arg0: i32, %arg1: memref<16x16x128xf32, #tpu.memory_space<vmem>>, %arg2: memref<384x128xbf16, #tpu.memory_space<vmem>>, %arg3: memref<128x128xbf16, #tpu.memory_space<vmem>>, %arg4: memref<1x128xf32, #tpu.memory_space<vmem>>, %arg5: memref<384x128xbf16, #tpu.memory_space<vmem>>, %arg6: memref<128x128xbf16, #tpu.memory_space<vmem>>, %arg7: memref<1x128xf32, #tpu.memory_space<vmem>>, %arg8: memref<16x16x128xf32, #tpu.memory_space<vmem>>, %arg9: memref<16x18x128xf32, #tpu.memory_space<vmem>>) attributes {dimension_semantics = [#tpu.dimension_semantics<parallel>], iteration_bounds = array<i64: 2>, scalar_prefetch = 0 : i64, scratch_operands = 1 : i64, tpu.core_type = #tpu.core_type<tc>, window_params = [{transform_indices = @transform_0, window_bounds = array<i64: 16, 16, 128>}, {pipeline_mode = #tpu.pipeline_mode<synchronous>, transform_indices = @transform_1, window_bounds = array<i64: 384, 128>}, {pipeline_mode = #tpu.pipeline_mode<synchronous>, transform_indices = @transform_2, window_bounds = array<i64: 128, 128>}, {pipeline_mode = #tpu.pipeline_mode<synchronous>, transform_indices = @transform_3, window_bounds = array<i64: 1, 128>}, {pipeline_mode = #tpu.pipeline_mode<synchronous>, transform_indices = @transform_4, window_bounds = array<i64: 384, 128>}, {pipeline_mode = #tpu.pipeline_mode<synchronous>, transform_indices = @transform_5, window_bounds = array<i64: 128, 128>}, {pipeline_mode = #tpu.pipeline_mode<synchronous>, transform_indices = @transform_6, window_bounds = array<i64: 1, 128>}, {transform_indices = @transform_7, window_bounds = array<i64: 16, 16, 128>}]} {
    %c0 = arith.constant 0 : index
    %c0_0 = arith.constant 0 : index
    %c0_1 = arith.constant 0 : index
    %0 = vector.load %arg1[%c0, %c0_0, %c0_1] : memref<16x16x128xf32, #tpu.memory_space<vmem>>, vector<16x16x128xf32>
    %1 = vector.shape_cast %0 : vector<16x16x128xf32> to vector<256x128xf32>
    %cst = arith.constant 0.000000e+00 : f32
    %2 = vector.broadcast %cst : f32 to vector<16x1x128xf32>
    %c0_2 = arith.constant 0 : index
    %c0_3 = arith.constant 0 : index
    %c0_4 = arith.constant 0 : index
    %3 = vector.load %arg9[%c0_2, %c0_3, %c0_4] : memref<16x18x128xf32, #tpu.memory_space<vmem>>, vector<16x1x128xf32>
    tpu.vector_store %arg9[%c0_2, %c0_3, %c0_4], %2 {strides = array<i32>} : memref<16x18x128xf32, #tpu.memory_space<vmem>>, vector<16x1x128xf32>,
    %cst_5 = arith.constant 0.000000e+00 : f32
    %4 = vector.broadcast %cst_5 : f32 to vector<16x1x128xf32>
    %c0_6 = arith.constant 0 : index
    %c17 = arith.constant 17 : index
    %c0_7 = arith.constant 0 : index
    %5 = vector.load %arg9[%c0_6, %c17, %c0_7] : memref<16x18x128xf32, #tpu.memory_space<vmem>>, vector<16x1x128xf32>
    tpu.vector_store %arg9[%c0_6, %c17, %c0_7], %4 {strides = array<i32>} : memref<16x18x128xf32, #tpu.memory_space<vmem>>, vector<16x1x128xf32>,
    %c0_8 = arith.constant 0 : index
    %c1 = arith.constant 1 : index
    %c0_9 = arith.constant 0 : index
    %6 = vector.load %arg9[%c0_8, %c1, %c0_9] : memref<16x18x128xf32, #tpu.memory_space<vmem>>, vector<16x16x128xf32>
    tpu.vector_store %arg9[%c0_8, %c1, %c0_9], %0 {strides = array<i32>} : memref<16x18x128xf32, #tpu.memory_space<vmem>>, vector<16x16x128xf32>,
    %c0_10 = arith.constant 0 : index
    %c0_11 = arith.constant 0 : index
    %c0_12 = arith.constant 0 : index
    %7 = vector.load %arg9[%c0_10, %c0_11, %c0_12] : memref<16x18x128xf32, #tpu.memory_space<vmem>>, vector<16x16x128xf32>
    %8 = vector.shape_cast %7 : vector<16x16x128xf32> to vector<256x128xf32>
    %c0_13 = arith.constant 0 : index
    %c1_14 = arith.constant 1 : index
    %c0_15 = arith.constant 0 : index
    %9 = vector.load %arg9[%c0_13, %c1_14, %c0_15] : memref<16x18x128xf32, #tpu.memory_space<vmem>>, vector<16x16x128xf32>
    %10 = vector.shape_cast %9 : vector<16x16x128xf32> to vector<256x128xf32>
    %c0_16 = arith.constant 0 : index
    %c2 = arith.constant 2 : index
    %c0_17 = arith.constant 0 : index
    %11 = vector.load %arg9[%c0_16, %c2, %c0_17] : memref<16x18x128xf32, #tpu.memory_space<vmem>>, vector<16x16x128xf32>
    %12 = vector.shape_cast %11 : vector<16x16x128xf32> to vector<256x128xf32>
    %13 = tpu.concatenate %8, %10, %12 in 1 : vector<256x128xf32>, vector<256x128xf32>, vector<256x128xf32> -> vector<256x384xf32>
    %14 = arith.truncf %13 : vector<256x384xf32> to vector<256x384xbf16>
    %c0_18 = arith.constant 0 : index
    %c0_19 = arith.constant 0 : index
    %15 = vector.load %arg2[%c0_18, %c0_19] : memref<384x128xbf16, #tpu.memory_space<vmem>>, vector<384x128xbf16>
    %cst_20 = arith.constant dense<0.000000e+00> : vector<256x128xf32>
    %16 = tpu.matmul %14, %15, %cst_20 {dimension_numbers = #tpu.dot_dimension_numbers<[1], [0], [0], [1], [0, 0, 1, 1], [], []>} : vector<256x384xbf16>, vector<384x128xbf16>, vector<256x128xf32> -> vector<256x128xf32>
    %17 = arith.truncf %16 : vector<256x128xf32> to vector<256x128xbf16>
    %c0_21 = arith.constant 0 : index
    %c0_22 = arith.constant 0 : index
    %18 = vector.load %arg3[%c0_21, %c0_22] : memref<128x128xbf16, #tpu.memory_space<vmem>>, vector<128x128xbf16>
    %cst_23 = arith.constant dense<0.000000e+00> : vector<256x128xf32>
    %19 = tpu.matmul %17, %18, %cst_23 {dimension_numbers = #tpu.dot_dimension_numbers<[1], [0], [0], [1], [0, 0, 1, 1], [], []>} : vector<256x128xbf16>, vector<128x128xbf16>, vector<256x128xf32> -> vector<256x128xf32>
    %c0_24 = arith.constant 0 : index
    %c0_25 = arith.constant 0 : index
    %20 = vector.load %arg4[%c0_24, %c0_25] : memref<1x128xf32, #tpu.memory_space<vmem>>, vector<1x128xf32>
    %21 = vector.broadcast %20 : vector<1x128xf32> to vector<256x128xf32>
    %22 = arith.addf %19, %21 : vector<256x128xf32>
    %cst_26 = arith.constant 0.000000e+00 : f32
    %23 = vector.broadcast %cst_26 : f32 to vector<256x128xf32>
    %24 = arith.maximumf %22, %23 : vector<256x128xf32>
    %25 = vector.shape_cast %24 : vector<256x128xf32> to vector<16x16x128xf32>
    %c0_27 = arith.constant 0 : index
    %c1_28 = arith.constant 1 : index
    %c0_29 = arith.constant 0 : index
    %26 = vector.load %arg9[%c0_27, %c1_28, %c0_29] : memref<16x18x128xf32, #tpu.memory_space<vmem>>, vector<16x16x128xf32>
    tpu.vector_store %arg9[%c0_27, %c1_28, %c0_29], %25 {strides = array<i32>} : memref<16x18x128xf32, #tpu.memory_space<vmem>>, vector<16x16x128xf32>,
    %c0_30 = arith.constant 0 : index
    %c0_31 = arith.constant 0 : index
    %c0_32 = arith.constant 0 : index
    %27 = vector.load %arg9[%c0_30, %c0_31, %c0_32] : memref<16x18x128xf32, #tpu.memory_space<vmem>>, vector<16x16x128xf32>
    %28 = vector.shape_cast %27 : vector<16x16x128xf32> to vector<256x128xf32>
    %c0_33 = arith.constant 0 : index
    %c1_34 = arith.constant 1 : index
    %c0_35 = arith.constant 0 : index
    %29 = vector.load %arg9[%c0_33, %c1_34, %c0_35] : memref<16x18x128xf32, #tpu.memory_space<vmem>>, vector<16x16x128xf32>
    %30 = vector.shape_cast %29 : vector<16x16x128xf32> to vector<256x128xf32>
    %c0_36 = arith.constant 0 : index
    %c2_37 = arith.constant 2 : index
    %c0_38 = arith.constant 0 : index
    %31 = vector.load %arg9[%c0_36, %c2_37, %c0_38] : memref<16x18x128xf32, #tpu.memory_space<vmem>>, vector<16x16x128xf32>
    %32 = vector.shape_cast %31 : vector<16x16x128xf32> to vector<256x128xf32>
    %33 = tpu.concatenate %28, %30, %32 in 1 : vector<256x128xf32>, vector<256x128xf32>, vector<256x128xf32> -> vector<256x384xf32>
    %34 = arith.truncf %33 : vector<256x384xf32> to vector<256x384xbf16>
    %c0_39 = arith.constant 0 : index
    %c0_40 = arith.constant 0 : index
    %35 = vector.load %arg5[%c0_39, %c0_40] : memref<384x128xbf16, #tpu.memory_space<vmem>>, vector<384x128xbf16>
    %cst_41 = arith.constant dense<0.000000e+00> : vector<256x128xf32>
    %36 = tpu.matmul %34, %35, %cst_41 {dimension_numbers = #tpu.dot_dimension_numbers<[1], [0], [0], [1], [0, 0, 1, 1], [], []>} : vector<256x384xbf16>, vector<384x128xbf16>, vector<256x128xf32> -> vector<256x128xf32>
    %37 = arith.truncf %36 : vector<256x128xf32> to vector<256x128xbf16>
    %c0_42 = arith.constant 0 : index
    %c0_43 = arith.constant 0 : index
    %38 = vector.load %arg6[%c0_42, %c0_43] : memref<128x128xbf16, #tpu.memory_space<vmem>>, vector<128x128xbf16>
    %cst_44 = arith.constant dense<0.000000e+00> : vector<256x128xf32>
    %39 = tpu.matmul %37, %38, %cst_44 {dimension_numbers = #tpu.dot_dimension_numbers<[1], [0], [0], [1], [0, 0, 1, 1], [], []>} : vector<256x128xbf16>, vector<128x128xbf16>, vector<256x128xf32> -> vector<256x128xf32>
    %c0_45 = arith.constant 0 : index
    %c0_46 = arith.constant 0 : index
    %40 = vector.load %arg7[%c0_45, %c0_46] : memref<1x128xf32, #tpu.memory_space<vmem>>, vector<1x128xf32>
    %41 = vector.broadcast %40 : vector<1x128xf32> to vector<256x128xf32>
    %42 = arith.addf %39, %41 : vector<256x128xf32>
    %43 = arith.addf %42, %1 : vector<256x128xf32>
    %cst_47 = arith.constant 0.000000e+00 : f32
    %44 = vector.broadcast %cst_47 : f32 to vector<256x128xf32>
    %45 = arith.maximumf %43, %44 : vector<256x128xf32>
    %46 = vector.shape_cast %45 : vector<256x128xf32> to vector<16x16x128xf32>
    %c0_48 = arith.constant 0 : index
    %c0_49 = arith.constant 0 : index
    %c0_50 = arith.constant 0 : index
    %47 = vector.load %arg8[%c0_48, %c0_49, %c0_50] : memref<16x16x128xf32, #tpu.memory_space<vmem>>, vector<16x16x128xf32>
    tpu.vector_store %arg8[%c0_48, %c0_49, %c0_50], %46 {strides = array<i32>} : memref<16x16x128xf32, #tpu.memory_space<vmem>>, vector<16x16x128xf32>,
    return
  }
  func.func @transform_0(%arg0: i32) -> (i32, i32, i32) {
    %c0_i32 = arith.constant 0 : i32
    %c0_i32_0 = arith.constant 0 : i32
    %c0_i32_1 = arith.constant 0 : i32
    return %arg0, %c0_i32, %c0_i32_0 : i32, i32, i32
  }
  func.func @transform_1(%arg0: i32) -> (i32, i32) {
    %c0_i32 = arith.constant 0 : i32
    %c0_i32_0 = arith.constant 0 : i32
    %c0_i32_1 = arith.constant 0 : i32
    return %c0_i32, %c0_i32_0 : i32, i32
  }
  func.func @transform_2(%arg0: i32) -> (i32, i32) {
    %c0_i32 = arith.constant 0 : i32
    %c0_i32_0 = arith.constant 0 : i32
    %c0_i32_1 = arith.constant 0 : i32
    return %c0_i32, %c0_i32_0 : i32, i32
  }
  func.func @transform_3(%arg0: i32) -> (i32, i32) {
    %c0_i32 = arith.constant 0 : i32
    %c0_i32_0 = arith.constant 0 : i32
    %c0_i32_1 = arith.constant 0 : i32
    return %c0_i32, %c0_i32_0 : i32, i32
  }
  func.func @transform_4(%arg0: i32) -> (i32, i32) {
    %c0_i32 = arith.constant 0 : i32
    %c0_i32_0 = arith.constant 0 : i32
    %c0_i32_1 = arith.constant 0 : i32
    return %c0_i32, %c0_i32_0 : i32, i32
  }
  func.func @transform_5(%arg0: i32) -> (i32, i32) {
    %c0_i32 = arith.constant 0 : i32
    %c0_i32_0 = arith.constant 0 : i32
    %c0_i32_1 = arith.constant 0 : i32
    return %c0_i32, %c0_i32_0 : i32, i32
  }
  func.func @transform_6(%arg0: i32) -> (i32, i32) {
    %c0_i32 = arith.constant 0 : i32
    %c0_i32_0 = arith.constant 0 : i32
    %c0_i32_1 = arith.constant 0 : i32
    return %c0_i32, %c0_i32_0 : i32, i32
  }
  func.func @transform_7(%arg0: i32) -> (i32, i32, i32) {
    %c0_i32 = arith.constant 0 : i32
    %c0_i32_0 = arith.constant 0 : i32
    %c0_i32_1 = arith.constant 0 : i32
    return %arg0, %c0_i32, %c0_i32_0 : i32, i32, i32
  }
}

</mosaic_0001>

<bundles_post_ra>
// kernel: basic_block_asymmetric.1
= control target key start
LH: loop header
LB: loop body
LE: loop exit
PB: predicated region body
PF: predicated region fallthrough
CT: control target
= control target key end

     0   :  { %s3129_s24 = smov 0   ;;  %s3685_s0 = inlined_call_operand.vmem [shape: f32[32,16,128], index: 0, kind: input, shape index: {}]   ;;  %s3686_s1 = inlined_call_operand.vmem [shape: bf16[384,128], index: 1, kind: input, shape index: {}]   ;;  %s3687_s2 = inlined_call_operand.vmem [shape: bf16[128,128], index: 2, kind: input, shape index: {}]   ;;  %s3688_s3 = inlined_call_operand.vmem [shape: f32[1,128], index: 3, kind: input, shape index: {}]   ;;  %s3689_s4 = inlined_call_operand.vmem [shape: bf16[384,128], index: 4, kind: input, shape index: {}]   ;;  %s3690_s5 = inlined_call_operand.vmem [shape: bf16[128,128], index: 5, kind: input, shape index: {}]   ;;  %s3691_s6 = inlined_call_operand.vmem [shape: f32[1,128], index: 6, kind: input, shape index: {}]   ;;  %s3692_s7 = inlined_call_operand.vmem [shape: f32[32,16,128], index: 7, kind: output, shape index: {}]  }
   0x1 LB: > { %s2414_s25 = sadd.s32 4294967295, %s3086_s24   ;;  %p2418_p0 = scmp.ge.s32.totalorder %s3086_s24, 1  ;;  %s3086_s24 = sphi %s3129_s24, %s17_s24  }
   0x2   : > { %p239_p1 = scmp.lt.s32.totalorder %s3086_s24, 3 }
   0x4   : > { %p240_p2 = pnand %p2418_p0, %p239_p1 }
   0x6   : > { %243 = sbr.rel (%p240_p2) target bundleno = 1068 (0x42c), region = 48 }
   0xd   : > { %v3016_v0 = vld [vmem:[%s3686_s1 + $0x40] sm:$0xff]   ;;  %v3019_v3 = vld [vmem:[%s3686_s1 + $0x48] sm:$0xff]   ;;  %v3088_v4 = vmov 0.0   ;;  %v3022_v7 = vld [vmem:[%s3686_s1 + $0x50] sm:$0xff]   ;;  %s2419_s19 = sshll.u32 %s2414_s25, 4 }
   0xe   : > { %v3017_v1 = vld [vmem:[%s3686_s1] sm:$0xff]   ;;  %2495 = vmatprep.subr.bf16.mxu0 %v3016_v0  ;;  %320 = vst [vmem:[#allocation2] sm:$0x1] %v3088_v4  ;;  %321 = vst [vmem:[#allocation2 + $0x18] sm:$0x1] %v3088_v4  ;;  %v3020_v5 = vld [vmem:[%s3686_s1 + $0x8] sm:$0xff]  }
   0xf   : > { %v3018_v2 = vld [vmem:[%s3686_s1 + $0x80] sm:$0xff]   ;;  %2496 = vmatpush3.bf16.msra.mxu0 %v3017_v1  ;;  %322 = vst [vmem:[#allocation2 + $0x30] sm:$0x1] %v3088_v4  ;;  %323 = vst [vmem:[#allocation2 + $0x48] sm:$0x1] %v3088_v4  ;;  %v3021_v6 = vld [vmem:[%s3686_s1 + $0x88] sm:$0xff]  }
  0x10   : > { %324 = vst [vmem:[#allocation2 + $0x60] sm:$0x1] %v3088_v4  ;;  %325 = vst [vmem:[#allocation2 + $0x78] sm:$0x1] %v3088_v4  ;;  %2815 = vmatprep.subr.bf16.mxu1 %v3018_v2  ;;  %2497 = vmatprep.subr.bf16.mxu0 %v3019_v3  ;;  %v3023_v8 = vld [vmem:[%s3686_s1 + $0x10] sm:$0xff]   ;;  %v3025_v10 = vld [vmem:[%s3686_s1 + $0x58] sm:$0xff]  }
  0x11   : > { %326 = vst [vmem:[#allocation2 + $0x90] sm:$0x1] %v3088_v4  ;;  %327 = vst [vmem:[#allocation2 + $0xa8] sm:$0x1] %v3088_v4  ;;  %2816 = vmatpush3.bf16.msra.mxu1 %v3018_v2  ;;  %v3024_v9 = vld [vmem:[%s3686_s1 + $0x90] sm:$0xff]   ;;  %v3026_v11 = vld [vmem:[%s3686_s1 + $0x18] sm:$0xff]  }
  0x12   : > { %328 = vst [vmem:[#allocation2 + $0xc0] sm:$0x1] %v3088_v4  ;;  %329 = vst [vmem:[#allocation2 + $0xd8] sm:$0x1] %v3088_v4  ;;  %2817 = vmatprep.subr.bf16.mxu1 %v3021_v6  ;;  %p274_p3 = scmp.lt.s32.totalorder %s2419_s19, 31  ;;  %v3027_v12 = vld [vmem:[%s3686_s1 + $0x98] sm:$0xff]  }
  0x13   : > { %330 = vst [vmem:[#allocation2 + $0xf0] sm:$0x1] %v3088_v4  ;;  %331 = vst [vmem:[#allocation2 + $0x108] sm:$0x1] %v3088_v4  ;;  %2498 = vmatpush3.bf16.msra.mxu0 %v3020_v5  ;;  %v3028_v13 = vld [vmem:[%s3686_s1 + $0x60] sm:$0xff]   ;;  %v3031_v16 = vld [vmem:[%s3686_s1 + $0x68] sm:$0xff]  }
  0x14   : > { %332 = vst [vmem:[#allocation2 + $0x120] sm:$0x1] %v3088_v4  ;;  %333 = vst [vmem:[#allocation2 + $0x138] sm:$0x1] %v3088_v4  ;;  %2499 = vmatprep.subr.bf16.mxu0 %v3022_v7  ;;  %v3030_v14 = vld [vmem:[%s3686_s1 + $0xa0] sm:$0xff]   ;;  %s3706_s19 = smov (!%p274_p3, %s2419_s19), 31 }
  0x15   : > { %334 = vst [vmem:[#allocation2 + $0x150] sm:$0x1] %v3088_v4  ;;  %335 = vst [vmem:[#allocation2 + $0x168] sm:$0x1] %v3088_v4  ;;  %2818 = vmatpush3.bf16.msra.mxu1 %v3021_v6  ;;  %v3029_v15 = vld [vmem:[%s3686_s1 + $0x20] sm:$0xff]   ;;  %v3033_v17 = vld [vmem:[%s3686_s1 + $0xa8] sm:$0xff]  }
  0x16   : > { %336 = vst [vmem:[#allocation2 + $0x11] sm:$0x1] %v3088_v4  ;;  %337 = vst [vmem:[#allocation2 + $0x29] sm:$0x1] %v3088_v4  ;;  %2819 = vmatprep.subr.bf16.mxu1 %v3024_v9  ;;  %s2493_s16 = sshll.u32 %s3706_s19, 4  ;;  %v3032_v18 = vld [vmem:[%s3686_s1 + $0x28] sm:$0xff]  }
  0x17   : > { %338 = vst [vmem:[#allocation2 + $0x41] sm:$0x1] %v3088_v4  ;;  %339 = vst [vmem:[#allocation2 + $0x59] sm:$0x1] %v3088_v4  ;;  %2500 = vmatpush3.bf16.msra.mxu0 %v3023_v8  ;;  %v3034_v19 = vld [vmem:[%s3686_s1 + $0x70] sm:$0xff]   ;;  %s3207_s28 = scalar_lea.vmem %s3685_s0, %s2493_s16  ;;  %v3037_v22 = vld [vmem:[%s3686_s1 + $0x78] sm:$0xff]   ;;  %s3588_s21 = scalar_lea.vmem %s3692_s7, %s2493_s16 }
  0x18   : > { %340 = vst [vmem:[#allocation2 + $0x71] sm:$0x1] %v3088_v4  ;;  %341 = vst [vmem:[#allocation2 + $0x89] sm:$0x1] %v3088_v4  ;;  %2501 = vmatprep.subr.bf16.mxu0 %v3025_v10  ;;  %v3035_v20 = vld [vmem:[%s3686_s1 + $0x30] sm:$0xff]   ;;  %v3039_v23 = vld [vmem:[%s3686_s1 + $0xb8] sm:$0xff]  }
  0x19   : > { %342 = vst [vmem:[#allocation2 + $0xa1] sm:$0x1] %v3088_v4  ;;  %343 = vst [vmem:[#allocation2 + $0xb9] sm:$0x1] %v3088_v4  ;;  %2820 = vmatpush3.bf16.msra.mxu1 %v3024_v9  ;;  %v3036_v21 = vld [vmem:[%s3686_s1 + $0xb0] sm:$0xff]   ;;  %v3219_v24 = vld [vmem:[%s3207_s28] sm:$0xff] }
  0x1a   : > { %344 = vst [vmem:[#allocation2 + $0xd1] sm:$0x1] %v3088_v4  ;;  %345 = vst [vmem:[#allocation2 + $0xe9] sm:$0x1] %v3088_v4  ;;  %2821 = vmatprep.subr.bf16.mxu1 %v3027_v12  ;;  %v3222_v25 = vld [vmem:[%s3207_s28 + $0x8] sm:$0xff]  ;;  %v3225_v26 = vld [vmem:[%s3207_s28 + $0x10] sm:$0xff] }
  0x1b   : > { %346 = vst [vmem:[#allocation2 + $0x101] sm:$0x1] %v3088_v4  ;;  %347 = vst [vmem:[#allocation2 + $0x119] sm:$0x1] %v3088_v4  ;;  %2502 = vmatpush3.bf16.msra.mxu0 %v3026_v11  ;;  %v3038_v27 = vld [vmem:[%s3686_s1 + $0x38] sm:$0xff]   ;;  %v481_v28 = vpack.c.bf16 %v3222_v25, %v3219_v24  ;;  %v3239_v30 = vld [vmem:[%s3207_s28 + $0x20] sm:$0xff] }
  0x1c   : > { %348 = vst [vmem:[#allocation2 + $0x131] sm:$0x1] %v3088_v4  ;;  %349 = vst [vmem:[#allocation2 + $0x149] sm:$0x1] %v3088_v4  ;;  %2503 = vmatprep.subr.bf16.mxu0 %v3028_v13  ;;  %v3235_v29 = vld [vmem:[%s3207_s28 + $0x18] sm:$0xff]  ;;  %v3242_v31 = vld [vmem:[%s3207_s28 + $0x28] sm:$0xff] }
  0x1d   : > { %350 = vst [vmem:[#allocation2 + $0x161] sm:$0x1] %v3088_v4  ;;  %351 = vst [vmem:[#allocation2 + $0x179] sm:$0x1] %v3088_v4  ;;  %2822 = vmatpush3.bf16.msra.mxu1 %v3027_v12  ;;  %v3248_v32 = vld [vmem:[%s3207_s28 + $0x30] sm:$0xff]  ;;  %v3251_v33 = vld [vmem:[%s3207_s28 + $0x38] sm:$0xff]  ;;  %752 = vmatprep.mubr.bf16.mxu0 %v481_v28  ;;  %v484_v53 = vpack.c.bf16 %v3235_v29, %v3225_v26  ;;  %v487_v6 = vpack.c.bf16 %v3242_v31, %v3239_v30 }
  0x1e   : > { %2823 = vmatprep.subr.bf16.mxu1 %v3030_v14  ;;  %352 = vst [vmem:[#allocation2 + $0x1] sm:$0xff] %v3219_v24  ;;  %353 = vst [vmem:[#allocation2 + $0x9] sm:$0xff] %v3222_v25  ;;  %v3254_v34 = vld [vmem:[%s3207_s28 + $0x40] sm:$0xff]  ;;  %v3259_v35 = vld [vmem:[%s3207_s28 + $0x48] sm:$0xff] }
  0x1f   : > { %2504 = vmatpush3.bf16.msra.mxu0 %v3029_v15  ;;  %354 = vst [vmem:[#allocation2 + $0x19] sm:$0xff] %v3225_v26  ;;  %355 = vst [vmem:[#allocation2 + $0x21] sm:$0xff] %v3235_v29  ;;  %v3263_v36 = vld [vmem:[%s3207_s28 + $0x50] sm:$0xff]  ;;  %v3266_v37 = vld [vmem:[%s3207_s28 + $0x58] sm:$0xff] }
  0x20   : > { %2505 = vmatprep.subr.bf16.mxu0 %v3031_v16  ;;  %356 = vst [vmem:[#allocation2 + $0x31] sm:$0xff] %v3239_v30  ;;  %357 = vst [vmem:[#allocation2 + $0x39] sm:$0xff] %v3242_v31  ;;  %v3272_v38 = vld [vmem:[%s3207_s28 + $0x60] sm:$0xff]  ;;  %v3275_v39 = vld [vmem:[%s3207_s28 + $0x68] sm:$0xff]  ;;  %v490_v16 = vpack.c.bf16 %v3251_v33, %v3248_v32 }
  0x21   : > { %2824 = vmatpush3.bf16.msra.mxu1 %v3030_v14  ;;  %358 = vst [vmem:[#allocation2 + $0x49] sm:$0xff] %v3248_v32  ;;  %359 = vst [vmem:[#allocation2 + $0x51] sm:$0xff] %v3251_v33  ;;  %v3278_v40 = vld [vmem:[%s3207_s28 + $0x70] sm:$0xff]  ;;  %v3283_v41 = vld [vmem:[%s3207_s28 + $0x78] sm:$0xff] }
  0x22   : > { %2825 = vmatprep.subr.bf16.mxu1 %v3033_v17  ;;  %360 = vst [vmem:[#allocation2 + $0x61] sm:$0xff] %v3254_v34  ;;  %361 = vst [vmem:[#allocation2 + $0x69] sm:$0xff] %v3259_v35  ;;  %v3287_v42 = vld [vmem:[%s3207_s28 + $0x80] sm:$0xff]  ;;  %v3290_v43 = vld [vmem:[%s3207_s28 + $0x88] sm:$0xff] }
  0x23   : > { %2506 = vmatpush3.bf16.msra.mxu0 %v3032_v18  ;;  %362 = vst [vmem:[#allocation2 + $0x79] sm:$0xff] %v3263_v36  ;;  %363 = vst [vmem:[#allocation2 + $0x81] sm:$0xff] %v3266_v37  ;;  %v3296_v44 = vld [vmem:[%s3207_s28 + $0x90] sm:$0xff]  ;;  %v3299_v45 = vld [vmem:[%s3207_s28 + $0x98] sm:$0xff] }
  0x24   : > { %2507 = vmatprep.subr.bf16.mxu0 %v3034_v19  ;;  %364 = vst [vmem:[#allocation2 + $0x91] sm:$0xff] %v3272_v38  ;;  %365 = vst [vmem:[#allocation2 + $0x99] sm:$0xff] %v3275_v39  ;;  %v3302_v46 = vld [vmem:[%s3207_s28 + $0xa0] sm:$0xff]  ;;  %v3307_v47 = vld [vmem:[%s3207_s28 + $0xa8] sm:$0xff] }
  0x25   : > { %2826 = vmatpush3.bf16.msra.mxu1 %v3033_v17  ;;  %366 = vst [vmem:[#allocation2 + $0xa9] sm:$0xff] %v3278_v40  ;;  %367 = vst [vmem:[#allocation2 + $0xb1] sm:$0xff] %v3283_v41  ;;  %v3311_v48 = vld [vmem:[%s3207_s28 + $0xb0] sm:$0xff]  ;;  %v3314_v49 = vld [vmem:[%s3207_s28 + $0xb8] sm:$0xff] }
  0x26   : > { %2827 = vmatprep.subr.bf16.mxu1 %v3036_v21  ;;  %368 = vst [vmem:[#allocation2 + $0xc1] sm:$0xff] %v3287_v42  ;;  %369 = vst [vmem:[#allocation2 + $0xc9] sm:$0xff] %v3290_v43  ;;  %v384_v50 = vld [vmem:[#allocation2] sm:$0xff]  ;;  %v385_v51 = vld [vmem:[#allocation2 + $0x8] sm:$0xff] }
  0x27   : > { %2508 = vmatpush3.bf16.msra.mxu0 %v3035_v20  ;;  %370 = vst [vmem:[#allocation2 + $0xd9] sm:$0xff] %v3296_v44  ;;  %371 = vst [vmem:[#allocation2 + $0xe1] sm:$0xff] %v3299_v45  ;;  %v448_v52 = vld [vmem:[#allocation2 + $0x2] sm:$0xff]  ;;  %v480_v54 = vpack.c.bf16 %v385_v51, %v384_v50  ;;  %v449_v55 = vld [vmem:[#allocation2 + $0xa] sm:$0xff] }
  0x28   : > { %2509 = vmatprep.subr.bf16.mxu0 %v3037_v22  ;;  %372 = vst [vmem:[#allocation2 + $0xf1] sm:$0xff] %v3302_v46  ;;  %373 = vst [vmem:[#allocation2 + $0xf9] sm:$0xff] %v3307_v47  ;;  %v450_v56 = vld [vmem:[#allocation2 + $0x1a] sm:$0xff]  ;;  %v451_v57 = vld [vmem:[#allocation2 + $0x22] sm:$0xff]  ;;  %v482_v58 = vpack.c.bf16 %v449_v55, %v448_v52 }
  0x29   : > { %2828 = vmatpush3.bf16.msra.mxu1 %v3036_v21  ;;  %374 = vst [vmem:[#allocation2 + $0x109] sm:$0xff] %v3311_v48  ;;  %375 = vst [vmem:[#allocation2 + $0x111] sm:$0xff] %v3314_v49  ;;  %v485_v59 = vpack.c.bf16 %v451_v57, %v450_v56  ;;  %v452_v60 = vld [vmem:[#allocation2 + $0x32] sm:$0xff]  ;;  %v453_v61 = vld [vmem:[#allocation2 + $0x3a] sm:$0xff] }
  0x2a   : > { %2829 = vmatprep.subr.bf16.mxu1 %v3039_v23  ;;  %2831 = vmatprep.mubr.bf16.mxu1 %v482_v58  ;;  %v386_v62 = vld [vmem:[#allocation2 + $0x18] sm:$0xff]  ;;  %v387_v63 = vld [vmem:[#allocation2 + $0x20] sm:$0xff]  ;;  %v488_v0 = vpack.c.bf16 %v453_v61, %v452_v60  ;;  %v454_v1 = vld [vmem:[#allocation2 + $0x4a] sm:$0xff]  ;;  %v493_v61 = vpack.c.bf16 %v3259_v35, %v3254_v34 }
  0x2b   : > { %2510 = vmatpush3.bf16.msra.mxu0 %v3038_v27  ;;  %v455_v2 = vld [vmem:[#allocation2 + $0x52] sm:$0xff]  ;;  %v483_v3 = vpack.c.bf16 %v387_v63, %v386_v62  ;;  %v456_v4 = vld [vmem:[#allocation2 + $0x62] sm:$0xff]  ;;  %v457_v5 = vld [vmem:[#allocation2 + $0x6a] sm:$0xff] }
  0x2c   : > { %v491_v7 = vpack.c.bf16 %v455_v2, %v454_v1  ;;  %v494_v8 = vpack.c.bf16 %v457_v5, %v456_v4  ;;  %v388_v9 = vld [vmem:[#allocation2 + $0x30] sm:$0xff]  ;;  %v389_v10 = vld [vmem:[#allocation2 + $0x38] sm:$0xff]  ;;  %v459_v12 = vld [vmem:[#allocation2 + $0x82] sm:$0xff] }
  0x2d   : > { %2830 = vmatpush3.bf16.msra.mxu1 %v3039_v23  ;;  %v458_v11 = vld [vmem:[#allocation2 + $0x7a] sm:$0xff]  ;;  %v486_v13 = vpack.c.bf16 %v389_v10, %v388_v9  ;;  %v460_v14 = vld [vmem:[#allocation2 + $0x92] sm:$0xff]  ;;  %v3329_v18 = vld [vmem:[%s3207_s28 + $0xc8] sm:$0xff]  ;;  %v496_v9 = vpack.c.bf16 %v3266_v37, %v3263_v36 }
  0x2e   : > { %753 = vmatmul.mubr.bf16.vlgmr.msra.gmra.mrb[0].mxu0 %v480_v54  ;;  %v461_v15 = vld [vmem:[#allocation2 + $0x9a] sm:$0xff]  ;;  %v3332_v19 = vld [vmem:[%s3207_s28 + $0xd0] sm:$0xff]  ;;  %v497_v20 = vpack.c.bf16 %v459_v12, %v458_v11  ;;  %377 = vst [vmem:[#allocation2 + $0x129] sm:$0xff] %v3329_v18  ;;  %v3344_v23 = vld [vmem:[%s3207_s28 + $0xe8] sm:$0xff] }
  0x2f   : > { %760 = vmatprep.mubr.bf16.mxu0 %v484_v53  ;;  %v3326_v17 = vld [vmem:[%s3207_s28 + $0xc0] sm:$0xff]  ;;  %v3337_v21 = vld [vmem:[%s3207_s28 + $0xd8] sm:$0xff]  ;;  %378 = vst [vmem:[#allocation2 + $0x139] sm:$0xff] %v3332_v19  ;;  %3698 = vst [vmem:[#allocation4_spill] sm:$0xff] %v3344_v23  ;;  %v500_v50 = vpack.c.bf16 %v461_v15, %v460_v14 }
  0x30   : > { %2832 = vmatmul.mubr.bf16.vlgmr.msra.gmra.mrb[0].mxu1 %v485_v59  ;;  %376 = vst [vmem:[#allocation2 + $0x121] sm:$0xff] %v3326_v17  ;;  %v3341_v22 = vld [vmem:[%s3207_s28 + $0xe0] sm:$0xff]  ;;  %v390_v27 = vld [vmem:[#allocation2 + $0x48] sm:$0xff]  ;;  %v391_v28 = vld [vmem:[#allocation2 + $0x50] sm:$0xff] }
  0x31   : > { %2835 = vmatprep.mubr.bf16.mxu1 %v488_v0  ;;  %3697 = vst [vmem:[#allocation3_spill] sm:$0xff] %v3341_v22  ;;  %379 = vst [vmem:[#allocation2 + $0x141] sm:$0xff] %v3337_v21  ;;  %v3350_v51 = vld [vmem:[%s3207_s28 + $0xf0] sm:$0xff]  ;;  %v3353_v52 = vld [vmem:[%s3207_s28 + $0xf8] sm:$0xff]  ;;  %v489_v59 = vpack.c.bf16 %v391_v28, %v390_v27 }
  0x32   : > { %380 = vst [vmem:[#allocation2 + $0x151] sm:$0xff] %v3341_v22  ;;  %381 = vst [vmem:[#allocation2 + $0x159] sm:$0xff] %v3344_v23  ;;  %v3040_v53 = vld [vmem:[%s3687_s2] sm:$0xff]   ;;  %v462_v54 = vld [vmem:[#allocation2 + $0xaa] sm:$0xff] }
  0x33   : > { %3699 = vst [vmem:[#allocation5_spill] sm:$0xff] %v3350_v51  ;;  %3700 = vst [vmem:[#allocation6_spill] sm:$0xff] %v3353_v52  ;;  %v463_v55 = vld [vmem:[#allocation2 + $0xb2] sm:$0xff]  ;;  %v3041_v56 = vld [vmem:[%s3687_s2 + $0x8] sm:$0xff]   ;;  %2863 = vmatprep.subr.bf16.mxu1 %v3040_v53 }
  0x34   : > { %382 = vst [vmem:[#allocation2 + $0x169] sm:$0xff] %v3350_v51  ;;  %383 = vst [vmem:[#allocation2 + $0x171] sm:$0xff] %v3353_v52  ;;  %v464_v57 = vld [vmem:[#allocation2 + $0xc2] sm:$0xff]  ;;  %v465_v58 = vld [vmem:[#allocation2 + $0xca] sm:$0xff]  ;;  %2864 = vmatpush3.bf16.msra.mxu1 %v3040_v53  ;;  %v503_v62 = vpack.c.bf16 %v463_v55, %v462_v54 }
  0x35   : > { %2865 = vmatprep.subr.bf16.mxu1 %v3041_v56  ;;  %v3042_v60 = vld [vmem:[%s3687_s2 + $0x10] sm:$0xff]   ;;  %v506_v63 = vpack.c.bf16 %v465_v58, %v464_v57  ;;  %v392_v0 = vld [vmem:[#allocation2 + $0x60] sm:$0xff]  ;;  %v3043_v1 = vld [vmem:[%s3687_s2 + $0x18] sm:$0xff]  }
  0x36   : > { %761 = vmatmul.mubr.bf16.gmra.mrb[4].mxu0 %v483_v3  ;;  %v393_v2 = vld [vmem:[#allocation2 + $0x68] sm:$0xff]  ;;  %v466_v3 = vld [vmem:[#allocation2 + $0xda] sm:$0xff]  ;;  %v468_v5 = vld [vmem:[#allocation2 + $0xf2] sm:$0xff] }
  0x37   : > { %768 = vmatprep.mubr.bf16.mxu0 %v487_v6  ;;  %v467_v4 = vld [vmem:[#allocation2 + $0xe2] sm:$0xff]  ;;  %v469_v6 = vld [vmem:[#allocation2 + $0xfa] sm:$0xff]  ;;  %v470_v15 = vld [vmem:[#allocation2 + $0x10a] sm:$0xff] }
  0x38   : > { %2836 = vmatmul.mubr.bf16.gmra.mrb[4].mxu1 %v491_v7  ;;  %v3044_v7 = vld [vmem:[%s3687_s2 + $0x20] sm:$0xff]   ;;  %v509_v10 = vpack.c.bf16 %v467_v4, %v466_v3  ;;  %v3045_v11 = vld [vmem:[%s3687_s2 + $0x28] sm:$0xff]   ;;  %v394_v12 = vld [vmem:[#allocation2 + $0x78] sm:$0xff]  ;;  %v512_v14 = vpack.c.bf16 %v469_v6, %v468_v5  ;;  %v505_v6 = vpack.c.bf16 %v3290_v43, %v3287_v42 }
  0x39   : > { %2839 = vmatprep.mubr.bf16.mxu1 %v494_v8  ;;  %2866 = vmatpush3.bf16.msra.mxu1 %v3041_v56  ;;  %v492_v8 = vpack.c.bf16 %v393_v2, %v392_v0  ;;  %v473_v27 = vld [vmem:[#allocation2 + $0x12a] sm:$0xff]  ;;  %v397_v55 = vld [vmem:[#allocation2 + $0x98] sm:$0xff]  ;;  %v475_v58 = vld [vmem:[#allocation2 + $0x142] sm:$0xff] }
  0x3a   : > { %2867 = vmatprep.subr.bf16.mxu1 %v3042_v60  ;;  %v396_v54 = vld [vmem:[#allocation2 + $0x90] sm:$0xff]  ;;  %v474_v57 = vld [vmem:[#allocation2 + $0x13a] sm:$0xff]  ;;  %v398_v0 = vld [vmem:[#allocation2 + $0xa8] sm:$0xff] }
  0x3b   : > { %v399_v2 = vld [vmem:[#allocation2 + $0xb0] sm:$0xff] }
  0x3c   : > { %v478_v3 = vld [vmem:[#allocation2 + $0x16a] sm:$0xff]  ;;  %v479_v4 = vld [vmem:[#allocation2 + $0x172] sm:$0xff]  ;;  %v501_v5 = vpack.c.bf16 %v399_v2, %v398_v0 }
  0x3d   : > { %2868 = vmatpush3.bf16.msra.mxu1 %v3042_v60  ;;  %v477_v60 = vld [vmem:[#allocation2 + $0x15a] sm:$0xff]  ;;  %v412_v2 = vld [vmem:[#allocation2 + $0x150] sm:$0xff] }
  0x3e   : > { %769 = vmatmul.mubr.bf16.gmra.mrb[8].mxu0 %v486_v13  ;;  %2869 = vmatprep.subr.bf16.mxu1 %v3043_v1  ;;  %v395_v13 = vld [vmem:[#allocation2 + $0x80] sm:$0xff] }
  0x3f   : > { %776 = vmatprep.mubr.bf16.mxu0 %v490_v16  ;;  %v471_v16 = vld [vmem:[#allocation2 + $0x112] sm:$0xff]  ;;  %v495_v28 = vpack.c.bf16 %v395_v13, %v394_v12  ;;  %v403_v13 = vld [vmem:[#allocation2 + $0xe0] sm:$0xff] }
  0x40   : > { %2840 = vmatmul.mubr.bf16.gmra.mrb[8].mxu1 %v497_v20  ;;  %v472_v20 = vld [vmem:[#allocation2 + $0x122] sm:$0xff]  ;;  %v515_v53 = vpack.c.bf16 %v471_v16, %v470_v15  ;;  %v402_v12 = vld [vmem:[#allocation2 + $0xd8] sm:$0xff]  ;;  %v511_v15 = vpack.c.bf16 %v3307_v47, %v3302_v46  ;;  %v404_v16 = vld [vmem:[#allocation2 + $0xf0] sm:$0xff] }
  0x41   : > { %2843 = vmatprep.mubr.bf16.mxu1 %v500_v50  ;;  %2870 = vmatpush3.bf16.msra.mxu1 %v3043_v1  ;;  %v499_v50 = vpack.c.bf16 %v3275_v39, %v3272_v38  ;;  %v518_v56 = vpack.c.bf16 %v473_v27, %v472_v20  ;;  %v405_v20 = vld [vmem:[#allocation2 + $0xf8] sm:$0xff] }
  0x42   : > { %2871 = vmatprep.subr.bf16.mxu1 %v3044_v7  ;;  %v510_v27 = vpack.c.bf16 %v405_v20, %v404_v16  ;;  %v3050_v16 = vld [vmem:[%s3689_s4 + $0x48] sm:$0xff]  }
  0x43   : > { %v3051_v20 = vld [vmem:[%s3689_s4 + $0x8] sm:$0xff]  }
  0x45   : > { %2872 = vmatpush3.bf16.msra.mxu1 %v3044_v7  ;;  %v527_v7 = vpack.c.bf16 %v479_v4, %v478_v3  ;;  %v413_v3 = vld [vmem:[#allocation2 + $0x158] sm:$0xff] }
  0x46   : > { %777 = vmatmul.mubr.bf16.gmra.mrb[12].mxu0 %v489_v59  ;;  %2873 = vmatprep.subr.bf16.mxu1 %v3045_v11  ;;  %v476_v59 = vld [vmem:[#allocation2 + $0x152] sm:$0xff]  ;;  %v522_v4 = vpack.c.bf16 %v413_v3, %v412_v2 }
  0x47   : > { %784 = vmatprep.mubr.bf16.mxu0 %v493_v61  ;;  %v498_v61 = vpack.c.bf16 %v397_v55, %v396_v54  ;;  %v524_v1 = vpack.c.bf16 %v477_v60, %v476_v59  ;;  %v517_v55 = vpack.c.bf16 %v3329_v18, %v3326_v17  ;;  %v520_v60 = vpack.c.bf16 %v3337_v21, %v3332_v19 }
  0x48   : > { %2844 = vmatmul.mubr.bf16.gmra.mrb[12].mxu1 %v503_v62  ;;  %v502_v62 = vpack.c.bf16 %v3283_v41, %v3278_v40 }
  0x49   : > { %2847 = vmatprep.mubr.bf16.mxu1 %v506_v63  ;;  %2874 = vmatpush3.bf16.msra.mxu1 %v3045_v11  ;;  %v521_v63 = vpack.c.bf16 %v475_v58, %v474_v57  ;;  %v508_v11 = vpack.c.bf16 %v3299_v45, %v3296_v44  ;;  %v408_v57 = vld [vmem:[#allocation2 + $0x120] sm:$0xff]  ;;  %v409_v58 = vld [vmem:[#allocation2 + $0x128] sm:$0xff] }
  0x4a   : > { %v516_v59 = vpack.c.bf16 %v409_v58, %v408_v57  ;;  %v3053_v57 = vld [vmem:[%s3689_s4 + $0x10] sm:$0xff]  }
  0x4e   : > { %785 = vmatmul.mubr.bf16.gmra.mrb[16].mxu0 %v492_v8  ;;  %v400_v8 = vld [vmem:[#allocation2 + $0xc0] sm:$0xff] }
  0x4f   : > { %792 = vmatprep.mubr.bf16.mxu0 %v496_v9  ;;  %v401_v9 = vld [vmem:[#allocation2 + $0xc8] sm:$0xff] }
  0x50   : > { %2848 = vmatmul.mubr.bf16.gmra.mrb[16].mxu1 %v509_v10  ;;  %v504_v10 = vpack.c.bf16 %v401_v9, %v400_v8  ;;  %v3048_v9 = vld [vmem:[%s3689_s4 + $0x40] sm:$0xff]  }
  0x51   : > { %2851 = vmatprep.mubr.bf16.mxu1 %v512_v14  ;;  %v507_v14 = vpack.c.bf16 %v403_v13, %v402_v12  ;;  %2655 = vmatprep.subr.bf16.mxu0 %v3048_v9 }
  0x56   : > { %793 = vmatmul.mubr.bf16.gmra.mrb[20].mxu0 %v495_v28  ;;  %v514_v28 = vpack.c.bf16 %v3314_v49, %v3311_v48 }
  0x57   : > { %800 = vmatprep.mubr.bf16.mxu0 %v499_v50  ;;  %v406_v50 = vld [vmem:[#allocation2 + $0x108] sm:$0xff] }
  0x58   : > { %2852 = vmatmul.mubr.bf16.gmra.mrb[20].mxu1 %v515_v53  ;;  %v407_v53 = vld [vmem:[#allocation2 + $0x110] sm:$0xff] }
  0x59   : > { %2855 = vmatprep.mubr.bf16.mxu1 %v518_v56  ;;  %v513_v54 = vpack.c.bf16 %v407_v53, %v406_v50  ;;  %v3046_v56 = vld [vmem:[%s3687_s2 + $0x30] sm:$0xff]  }
  0x5a   : > { %2875 = vmatprep.subr.bf16.mxu1 %v3046_v56 }
  0x5b   : > { %2876 = vmatpush3.bf16.msra.mxu1 %v3046_v56 }
  0x5e   : > { %801 = vmatmul.mubr.bf16.gmra.mrb[24].mxu0 %v498_v61  ;;  %v3047_v61 = vld [vmem:[%s3687_s2 + $0x38] sm:$0xff]  }
  0x5f   : > { %808 = vmatprep.mubr.bf16.mxu0 %v502_v62  ;;  %v410_v62 = vld [vmem:[#allocation2 + $0x138] sm:$0xff]  ;;  %2877 = vmatprep.subr.bf16.mxu1 %v3047_v61 }
  0x60   : > { %2856 = vmatmul.mubr.bf16.gmra.mrb[24].mxu1 %v521_v63  ;;  %v411_v63 = vld [vmem:[#allocation2 + $0x140] sm:$0xff] }
  0x61   : > { %2859 = vmatprep.mubr.bf16.mxu1 %v524_v1  ;;  %2878 = vmatpush3.bf16.msra.mxu1 %v3047_v61  ;;  %v519_v0 = vpack.c.bf16 %v411_v63, %v410_v62  ;;  %v523_v1 = vpack.c.bf16 %v3344_v23, %v3341_v22 }
  0x66   : > { %809 = vmatmul.mubr.bf16.gmra.mrb[28].mxu0 %v501_v5  ;;  %v526_v5 = vpack.c.bf16 %v3353_v52, %v3350_v51 }
  0x67   : > { %816 = vmatprep.mubr.bf16.mxu0 %v505_v6  ;;  %v414_v6 = vld [vmem:[#allocation2 + $0x168] sm:$0xff] }
  0x68   : > { %2860 = vmatmul.mubr.bf16.gmra.mrb[28].mxu1 %v527_v7  ;;  %v415_v7 = vld [vmem:[#allocation2 + $0x170] sm:$0xff] }
  0x69   : > { %v525_v8 = vpack.c.bf16 %v415_v7, %v414_v6 }
  0x6e   : > { %817 = vmatmul.mubr.bf16.gmra.mrb[32].mxu0 %v504_v10  ;;  %v3049_v10 = vld [vmem:[%s3689_s4] sm:$0xff]  }
  0x6f   : > { %824 = vmatprep.mubr.bf16.mxu0 %v508_v11  ;;  %2656 = vmatpush3.bf16.msra.mxu0 %v3049_v10 }
  0x70   : > { %2657 = vmatprep.subr.bf16.mxu0 %v3050_v16 }
  0x73   : > { %2658 = vmatpush3.bf16.msra.mxu0 %v3051_v20 }
  0x76   : > { %825 = vmatmul.mubr.bf16.gmra.mrb[36].mxu0 %v507_v14 }
  0x77   : > { %832 = vmatprep.mubr.bf16.mxu0 %v511_v15 }
  0x7e   : > { %833 = vmatmul.mubr.bf16.gmra.mrb[40].mxu0 %v510_v27  ;;  %v3052_v27 = vld [vmem:[%s3689_s4 + $0x50] sm:$0xff]  }
  0x7f   : > { %840 = vmatprep.mubr.bf16.mxu0 %v514_v28  ;;  %2659 = vmatprep.subr.bf16.mxu0 %v3052_v27  ;;  %v3059_v27 = vld [vmem:[%s3689_s4 + $0x28] sm:$0xff]  }
  0x80   : > { %2660 = vmatpush3.bf16.msra.mxu0 %v3053_v57 }
  0x86   : > { %841 = vmatmul.mubr.bf16.gmra.mrb[44].mxu0 %v513_v54 }
  0x87   : > { %848 = vmatprep.mubr.bf16.mxu0 %v517_v55 }
  0x8e   : > { %849 = vmatmul.mubr.bf16.gmra.mrb[48].mxu0 %v516_v59  ;;  %v3054_v59 = vld [vmem:[%s3689_s4 + $0x58] sm:$0xff]  }
  0x8f   : > { %856 = vmatprep.mubr.bf16.mxu0 %v520_v60  ;;  %v3062_v60 = vld [vmem:[%s3689_s4 + $0x80] sm:$0xff]   ;;  %2661 = vmatprep.subr.bf16.mxu0 %v3054_v59 }
  0x90   : > { %2911 = vmatprep.subr.bf16.mxu1 %v3062_v60 }
  0x96   : > { %857 = vmatmul.mubr.bf16.gmra.mrb[52].mxu0 %v519_v0  ;;  %v3055_v0 = vld [vmem:[%s3689_s4 + $0x18] sm:$0xff]  }
  0x97   : > { %864 = vmatprep.mubr.bf16.mxu0 %v523_v1  ;;  %2662 = vmatpush3.bf16.msra.mxu0 %v3055_v0 }
  0x9e   : > { %865 = vmatmul.mubr.bf16.gmra.mrb[56].mxu0 %v522_v4  ;;  %v3056_v4 = vld [vmem:[%s3689_s4 + $0x60] sm:$0xff]  }
  0x9f   : > { %872 = vmatprep.mubr.bf16.mxu0 %v526_v5  ;;  %2663 = vmatprep.subr.bf16.mxu0 %v3056_v4 }
  0xa6   : > { %873 = vmatmul.mubr.bf16.gmra.mrb[60].mxu0 %v525_v8 }
 0x101   : > { %v2511_v11 = vpop.f32.mrb[0].mxu0 }
 0x102   : > { %v2512_v12 = vpop.f32.mrb[1].mxu0 }
 0x103   : > { %v2513_v13 = vadd.f32 %v2512_v12, %v2511_v11  ;;  %v2514_v14 = vpop.f32.mrb[2].mxu0  ;;  %v2833_v15 = vpop.f32.mrb[0].mxu1  ;;  %v3057_v11 = vld [vmem:[%s3689_s4 + $0x20] sm:$0xff]  }
 0x104   : > { %v2515_v28 = vpop.f32.mrb[3].mxu0  ;;  %v915_v50 = vpop.f32.mrb[1].mxu1  ;;  %2664 = vmatpush3.bf16.msra.mxu0 %v3057_v11 }
 0x105   : > { %v2516_v53 = vadd.f32 %v2515_v28, %v2514_v14  ;;  %v916_v54 = vadd.f32 %v2513_v13, %v915_v50  ;;  %v2834_v55 = vpop.f32.mrb[2].mxu1  ;;  %v3058_v13 = vld [vmem:[%s3689_s4 + $0x68] sm:$0xff]  }
 0x106   : > { %v918_v56 = vpop.f32.mrb[3].mxu1  ;;  %2665 = vmatprep.subr.bf16.mxu0 %v3058_v13 }
 0x107   : > { %v919_v58 = vadd.f32 %v2516_v53, %v918_v56 }
 0x108   : > { %2666 = vmatpush3.bf16.msra.mxu0 %v3059_v27 }
 0x109   : > { %v1042_v61 = vpack.c.bf16 %v919_v58, %v916_v54  ;;  %v2517_v62 = vpop.f32.mrb[4].mxu0  ;;  %v3060_v54 = vld [vmem:[%s3689_s4 + $0x70] sm:$0xff]  }
 0x10a   : > { %v2518_v63 = vpop.f32.mrb[5].mxu0  ;;  %2667 = vmatprep.subr.bf16.mxu0 %v3060_v54 }
 0x10b   : > { %v2519_v1 = vadd.f32 %v2518_v63, %v2517_v62  ;;  %v2520_v2 = vpop.f32.mrb[6].mxu0  ;;  %2879 = vmatprep.mubr.bf16.mxu1 %v1042_v61  ;;  %v2837_v3 = vpop.f32.mrb[4].mxu1  ;;  %v3064_v61 = vld [vmem:[%s3689_s4 + $0x90] sm:$0xff]  }
 0x10c   : > { %v2521_v5 = vpop.f32.mrb[7].mxu0  ;;  %v931_v6 = vpop.f32.mrb[5].mxu1  ;;  %v3061_v63 = vld [vmem:[%s3689_s4 + $0x30] sm:$0xff]  }
 0x10d   : > { %v924_v7 = vadd.f32 %v2833_v15, %v2519_v1  ;;  %v2522_v8 = vadd.f32 %v2521_v5, %v2520_v2  ;;  %v2838_v9 = vpop.f32.mrb[6].mxu1  ;;  %v3063_v15 = vld [vmem:[%s3689_s4 + $0x88] sm:$0xff]   ;;  %2668 = vmatpush3.bf16.msra.mxu0 %v3061_v63 }
 0x10e   : > { %v934_v10 = vpop.f32.mrb[7].mxu1 }
 0x10f   : > { %v927_v12 = vadd.f32 %v2834_v55, %v2522_v8 }
 0x111   : > { %v1043_v14 = vpack.c.bf16 %v927_v12, %v924_v7  ;;  %v2523_v16 = vpop.f32.mrb[8].mxu0 }
 0x112   : > { %v2524_v20 = vpop.f32.mrb[9].mxu0 }
 0x113   : > { %v2525_v28 = vadd.f32 %v2524_v20, %v2523_v16  ;;  %v2526_v50 = vpop.f32.mrb[10].mxu0  ;;  %2880 = vmatmul.mubr.bf16.vlgmr.msra.gmra.mrb[32].mxu1 %v1043_v14  ;;  %v2841_v53 = vpop.f32.mrb[8].mxu1 }
 0x114   : > { %v2527_v55 = vpop.f32.mrb[11].mxu0  ;;  %v947_v56 = vpop.f32.mrb[9].mxu1  ;;  %2912 = vmatpush3.bf16.msra.mxu1 %v3062_v60  ;;  %v3065_v60 = vld [vmem:[%s3689_s4 + $0x98] sm:$0xff]  }
 0x115   : > { %v2528_v57 = vadd.f32 %v2527_v55, %v2526_v50  ;;  %v932_v58 = vadd.f32 %v2525_v28, %v931_v6  ;;  %v2842_v59 = vpop.f32.mrb[10].mxu1  ;;  %2913 = vmatprep.subr.bf16.mxu1 %v3063_v15 }
 0x116   : > { %v950_v62 = vpop.f32.mrb[11].mxu1 }
 0x117   : > { %v935_v0 = vadd.f32 %v2528_v57, %v934_v10 }
 0x118   : > { %2914 = vmatpush3.bf16.msra.mxu1 %v3063_v15 }
 0x119   : > { %v1044_v1 = vpack.c.bf16 %v935_v0, %v932_v58  ;;  %v2529_v2 = vpop.f32.mrb[12].mxu0  ;;  %2915 = vmatprep.subr.bf16.mxu1 %v3064_v61 }
 0x11a   : > { %v2530_v4 = vpop.f32.mrb[13].mxu0 }
 0x11b   : > { %v2531_v5 = vadd.f32 %v2530_v4, %v2529_v2  ;;  %v2532_v6 = vpop.f32.mrb[14].mxu0  ;;  %2883 = vmatprep.mubr.bf16.mxu1 %v1044_v1  ;;  %v2845_v7 = vpop.f32.mrb[12].mxu1 }
 0x11c   : > { %v2533_v8 = vpop.f32.mrb[15].mxu0  ;;  %v963_v11 = vpop.f32.mrb[13].mxu1  ;;  %2916 = vmatpush3.bf16.msra.mxu1 %v3064_v61 }
 0x11d   : > { %v940_v12 = vadd.f32 %v2837_v3, %v2531_v5  ;;  %v2534_v10 = vadd.f32 %v2533_v8, %v2532_v6  ;;  %v2846_v13 = vpop.f32.mrb[14].mxu1  ;;  %2917 = vmatprep.subr.bf16.mxu1 %v3065_v60 }
 0x11e   : > { %v966_v14 = vpop.f32.mrb[15].mxu1 }
 0x11f   : > { %v943_v16 = vadd.f32 %v2838_v9, %v2534_v10 }
 0x120   : > { %2918 = vmatpush3.bf16.msra.mxu1 %v3065_v60 }
 0x121   : > { %v2535_v15 = vpop.f32.mrb[16].mxu0  ;;  %v1045_v20 = vpack.c.bf16 %v943_v16, %v940_v12 }
 0x122   : > { %v2536_v27 = vpop.f32.mrb[17].mxu0 }
 0x123   : > { %v2537_v28 = vadd.f32 %v2536_v27, %v2535_v15  ;;  %v2538_v50 = vpop.f32.mrb[18].mxu0  ;;  %2884 = vmatmul.mubr.bf16.gmra.mrb[36].mxu1 %v1045_v20  ;;  %v3459_v54 = vpop.f32.mrb[16].mxu1 }
 0x124   : > { %v2539_v55 = vpop.f32.mrb[19].mxu0  ;;  %v979_v57 = vpop.f32.mrb[17].mxu1 }
 0x125   : > { %v2540_v58 = vadd.f32 %v2539_v55, %v2538_v50  ;;  %v948_v63 = vadd.f32 %v2537_v28, %v947_v56  ;;  %v3461_v61 = vpop.f32.mrb[18].mxu1 }
 0x126   : > { %v982_v3 = vpop.f32.mrb[19].mxu1 }
 0x127   : > { %v951_v0 = vadd.f32 %v2540_v58, %v950_v62 }
 0x129   : > { %v1046_v1 = vpack.c.bf16 %v951_v0, %v948_v63  ;;  %v2541_v2 = vpop.f32.mrb[20].mxu0 }
 0x12a   : > { %v2542_v9 = vpop.f32.mrb[21].mxu0 }
 0x12b   : > { %v2543_v60 = vadd.f32 %v2542_v9, %v2541_v2  ;;  %v2544_v4 = vpop.f32.mrb[22].mxu0  ;;  %2887 = vmatprep.mubr.bf16.mxu1 %v1046_v1  ;;  %v3463_v5 = vpop.f32.mrb[20].mxu1 }
 0x12c   : > { %v2545_v6 = vpop.f32.mrb[23].mxu0  ;;  %v995_v8 = vpop.f32.mrb[21].mxu1 }
 0x12d   : > { %v956_v12 = vadd.f32 %v2841_v53, %v2543_v60  ;;  %v2546_v10 = vadd.f32 %v2545_v6, %v2544_v4  ;;  %v3465_v16 = vpop.f32.mrb[22].mxu1 }
 0x12e   : > { %v998_v15 = vpop.f32.mrb[23].mxu1 }
 0x12f   : > { %v959_v56 = vadd.f32 %v2842_v59, %v2546_v10 }
 0x131   : > { %v2547_v20 = vpop.f32.mrb[24].mxu0  ;;  %v1047_v27 = vpack.c.bf16 %v959_v56, %v956_v12 }
 0x132   : > { %v2548_v28 = vpop.f32.mrb[25].mxu0 }
 0x133   : > { %v2549_v62 = vadd.f32 %v2548_v28, %v2547_v20  ;;  %v2550_v50 = vpop.f32.mrb[26].mxu0  ;;  %2888 = vmatmul.mubr.bf16.gmra.mrb[40].mxu1 %v1047_v27  ;;  %v3467_v55 = vpop.f32.mrb[24].mxu1 }
 0x134   : > { %v2551_v58 = vpop.f32.mrb[27].mxu0  ;;  %v3469_v63 = vpop.f32.mrb[25].mxu1 }
 0x135   : > { %v2552_v0 = vadd.f32 %v2551_v58, %v2550_v50  ;;  %v964_v1 = vadd.f32 %v2549_v62, %v963_v11  ;;  %v3471_v2 = vpop.f32.mrb[26].mxu1 }
 0x136   : > { %v3473_v53 = vpop.f32.mrb[27].mxu1 }
 0x137   : > { %v967_v9 = vadd.f32 %v2552_v0, %v966_v14 }
 0x139   : > { %v1048_v60 = vpack.c.bf16 %v967_v9, %v964_v1  ;;  %v2553_v59 = vpop.f32.mrb[28].mxu0 }
 0x13a   : > { %v2554_v4 = vpop.f32.mrb[29].mxu0 }
 0x13b   : > { %v2555_v6 = vadd.f32 %v2554_v4, %v2553_v59  ;;  %v2556_v12 = vpop.f32.mrb[30].mxu0  ;;  %2891 = vmatprep.mubr.bf16.mxu1 %v1048_v60  ;;  %v3475_v10 = vpop.f32.mrb[28].mxu1 }
 0x13c   : > { %v2557_v56 = vpop.f32.mrb[31].mxu0  ;;  %v3477_v20 = vpop.f32.mrb[29].mxu1 }
 0x13d   : > { %v972_v27 = vadd.f32 %v2845_v7, %v2555_v6  ;;  %v2558_v28 = vadd.f32 %v2557_v56, %v2556_v12  ;;  %v3479_v50 = vpop.f32.mrb[30].mxu1 }
 0x13e   : > { %v3481_v11 = vpop.f32.mrb[31].mxu1 }
 0x13f   : > { %v975_v62 = vadd.f32 %v2846_v13, %v2558_v28 }
 0x141   : > { %v2559_v58 = vpop.f32.mrb[32].mxu0  ;;  %v1049_v14 = vpack.c.bf16 %v975_v62, %v972_v27 }
 0x142   : > { %v2560_v0 = vpop.f32.mrb[33].mxu0 }
 0x143   : > { %v2561_v1 = vadd.f32 %v2560_v0, %v2559_v58  ;;  %v2562_v9 = vpop.f32.mrb[34].mxu0  ;;  %2892 = vmatmul.mubr.bf16.gmra.mrb[44].mxu1 %v1049_v14 }
 0x144   : > { %v2563_v59 = vpop.f32.mrb[35].mxu0 }
 0x145   : > { %v2564_v60 = vadd.f32 %v2563_v59, %v2562_v9  ;;  %v980_v4 = vadd.f32 %v2561_v1, %v979_v57 }
 0x147   : > { %v983_v23 = vadd.f32 %v2564_v60, %v982_v3 }
 0x149   : > { %v1050_v52 = vpack.c.bf16 %v983_v23, %v980_v4  ;;  %v2565_v22 = vpop.f32.mrb[36].mxu0 }
 0x14a   : > { %v2566_v51 = vpop.f32.mrb[37].mxu0 }
 0x14b   : > { %v2567_v7 = vadd.f32 %v2566_v51, %v2565_v22  ;;  %v2568_v6 = vpop.f32.mrb[38].mxu0  ;;  %2895 = vmatprep.mubr.bf16.mxu1 %v1050_v52 }
 0x14c   : > { %v2569_v12 = vpop.f32.mrb[39].mxu0 }
 0x14d   : > { %v988_v56 = vadd.f32 %v3459_v54, %v2567_v7  ;;  %v2570_v13 = vadd.f32 %v2569_v12, %v2568_v6 }
 0x14f   : > { %v991_v27 = vadd.f32 %v3461_v61, %v2570_v13 }
 0x151   : > { %v2571_v28 = vpop.f32.mrb[40].mxu0  ;;  %v1051_v62 = vpack.c.bf16 %v991_v27, %v988_v56 }
 0x152   : > { %v2572_v58 = vpop.f32.mrb[41].mxu0 }
 0x153   : > { %v2573_v14 = vadd.f32 %v2572_v58, %v2571_v28  ;;  %v2574_v0 = vpop.f32.mrb[42].mxu0  ;;  %2896 = vmatmul.mubr.bf16.gmra.mrb[48].mxu1 %v1051_v62  ;;  %v3068_v62 = vld [vmem:[%s3689_s4 + $0xa0] sm:$0xff]  }
 0x154   : > { %v2575_v57 = vpop.f32.mrb[43].mxu0  ;;  %2919 = vmatprep.subr.bf16.mxu1 %v3068_v62 }
 0x155   : > { %v2576_v3 = vadd.f32 %v2575_v57, %v2574_v0  ;;  %v996_v23 = vadd.f32 %v2573_v14, %v995_v8  ;;  %2920 = vmatpush3.bf16.msra.mxu1 %v3068_v62  ;;  %v3069_v57 = vld [vmem:[%s3689_s4 + $0xa8] sm:$0xff]  }
 0x156   : > { %2921 = vmatprep.subr.bf16.mxu1 %v3069_v57 }
 0x157   : > { %v999_v1 = vadd.f32 %v2576_v3, %v998_v15 }
 0x159   : > { %v1052_v9 = vpack.c.bf16 %v999_v1, %v996_v23  ;;  %v2577_v22 = vpop.f32.mrb[44].mxu0  ;;  %v3066_v23 = vld [vmem:[%s3689_s4 + $0x78] sm:$0xff]   ;;  %2922 = vmatpush3.bf16.msra.mxu1 %v3069_v57 }
 0x15a   : > { %v2578_v51 = vpop.f32.mrb[45].mxu0  ;;  %v3067_v1 = vld [vmem:[%s3689_s4 + $0x38] sm:$0xff]   ;;  %2669 = vmatprep.subr.bf16.mxu0 %v3066_v23 }
 0x15b   : > { %v2579_v52 = vadd.f32 %v2578_v51, %v2577_v22  ;;  %v2580_v59 = vpop.f32.mrb[46].mxu0  ;;  %2899 = vmatprep.mubr.bf16.mxu1 %v1052_v9  ;;  %v3070_v9 = vld [vmem:[%s3689_s4 + $0xb0] sm:$0xff]   ;;  %2670 = vmatpush3.bf16.msra.mxu0 %v3067_v1 }
 0x15c   : > { %v2581_v54 = vpop.f32.mrb[47].mxu0  ;;  %2923 = vmatprep.subr.bf16.mxu1 %v3070_v9 }
 0x15d   : > { %v1004_v60 = vadd.f32 %v3463_v5, %v2579_v52  ;;  %v2582_v61 = vadd.f32 %v2581_v54, %v2580_v59  ;;  %2924 = vmatpush3.bf16.msra.mxu1 %v3070_v9 }
 0x15f   : > { %v1007_v4 = vadd.f32 %v3465_v16, %v2582_v61 }
 0x161   : > { %v2583_v7 = vpop.f32.mrb[48].mxu0  ;;  %v1053_v6 = vpack.c.bf16 %v1007_v4, %v1004_v60 }
 0x162   : > { %v2584_v12 = vpop.f32.mrb[49].mxu0 }
 0x163   : > { %v2585_v56 = vadd.f32 %v2584_v12, %v2583_v7  ;;  %v2586_v13 = vpop.f32.mrb[50].mxu0  ;;  %2900 = vmatmul.mubr.bf16.gmra.mrb[52].mxu1 %v1053_v6 }
 0x164   : > { %v2587_v8 = vpop.f32.mrb[51].mxu0 }
 0x165   : > { %v2588_v15 = vadd.f32 %v2587_v8, %v2586_v13  ;;  %v1012_v27 = vadd.f32 %v2585_v56, %v3469_v63 }
 0x167   : > { %v1015_v28 = vadd.f32 %v2588_v15, %v3473_v53 }
 0x169   : > { %v1054_v5 = vpack.c.bf16 %v1015_v28, %v1012_v27  ;;  %v2589_v58 = vpop.f32.mrb[52].mxu0 }
 0x16a   : > { %v2590_v16 = vpop.f32.mrb[53].mxu0 }
 0x16b   : > { %v2591_v14 = vadd.f32 %v2590_v16, %v2589_v58  ;;  %v2592_v0 = vpop.f32.mrb[54].mxu0  ;;  %2903 = vmatprep.mubr.bf16.mxu1 %v1054_v5 }
 0x16c   : > { %v2593_v3 = vpop.f32.mrb[55].mxu0 }
 0x16d   : > { %v1020_v63 = vadd.f32 %v3467_v55, %v2591_v14  ;;  %v2594_v53 = vadd.f32 %v2593_v3, %v2592_v0  ;;  %v3071_v55 = vld [vmem:[%s3689_s4 + $0xb8] sm:$0xff]  }
 0x16e   : > { %2925 = vmatprep.subr.bf16.mxu1 %v3071_v55 }
 0x16f   : > { %v1023_v22 = vadd.f32 %v3471_v2, %v2594_v53  ;;  %2926 = vmatpush3.bf16.msra.mxu1 %v3071_v55 }
 0x171   : > { %v2595_v51 = vpop.f32.mrb[56].mxu0  ;;  %v1055_v52 = vpack.c.bf16 %v1023_v22, %v1020_v63  ;;  %v3072_v22 = vld [vmem:[%s3690_s5] sm:$0xff]  }
 0x172   : > { %v2596_v59 = vpop.f32.mrb[57].mxu0  ;;  %2959 = vmatprep.subr.bf16.mxu1 %v3072_v22 }
 0x173   : > { %v2597_v54 = vadd.f32 %v2596_v59, %v2595_v51  ;;  %v2598_v60 = vpop.f32.mrb[58].mxu0  ;;  %2904 = vmatmul.mubr.bf16.gmra.mrb[56].mxu1 %v1055_v52 }
 0x174   : > { %v2599_v61 = vpop.f32.mrb[59].mxu0 }
 0x175   : > { %v2600_v4 = vadd.f32 %v2599_v61, %v2598_v60  ;;  %v1028_v7 = vadd.f32 %v2597_v54, %v3477_v20  ;;  %v3516_v20 = vld [vmem:[%s3688_s3] ss:$0 sm:$0xff] }
 0x177   : > { %v1031_v2 = vadd.f32 %v2600_v4, %v3481_v11 }
 0x179   : > { %v1056_v6 = vpack.c.bf16 %v1031_v2, %v1028_v7  ;;  %v2601_v12 = vpop.f32.mrb[60].mxu0 }
 0x17a   : > { %v2602_v56 = vpop.f32.mrb[61].mxu0 }
 0x17b   : > { %v2603_v13 = vadd.f32 %v2602_v56, %v2601_v12  ;;  %v2604_v8 = vpop.f32.mrb[62].mxu0  ;;  %2907 = vmatprep.mubr.bf16.mxu1 %v1056_v6  ;;  %v3073_v56 = vld [vmem:[%s3690_s5 + $0x8] sm:$0xff]  }
 0x17c   : > { %v2605_v15 = vpop.f32.mrb[63].mxu0 }
 0x17d   : > { %v1036_v27 = vadd.f32 %v3475_v10, %v2603_v13  ;;  %v2606_v28 = vadd.f32 %v2605_v15, %v2604_v8 }
 0x17f   : > { %v1039_v62 = vadd.f32 %v3479_v50, %v2606_v28 }
 0x181   : > { %v1057_v5 = vpack.c.bf16 %v1039_v62, %v1036_v27 }
 0x183   : > { %2908 = vmatmul.mubr.bf16.gmra.mrb[60].mxu1 %v1057_v5 }
 0x1e6   : > { %v2881_v11 = vpop.f32.mrb[32].mxu1 }
 0x1e7   : > { %v1172_v58 = vadd.f32 %v2881_v11, %v3516_v20  ;;  %v1163_v16 = vpop.f32.mrb[33].mxu1 }
 0x1e8   : > { %v1164_v14 = vadd.f32 %v3516_v20, %v1163_v16  ;;  %v2882_v0 = vpop.f32.mrb[34].mxu1  ;;  %v3074_v16 = vld [vmem:[%s3690_s5 + $0x10] sm:$0xff]  }
 0x1e9   : > { %v1292_v57 = vmax.f32 %v1172_v58, 0.0  ;;  %v1175_v10 = vadd.f32 %v2882_v0, %v3516_v20  ;;  %v1166_v3 = vpop.f32.mrb[35].mxu1 }
 0x1ea   : > { %v1290_v63 = vmax.f32 %v1164_v14, 0.0  ;;  %v1167_v50 = vadd.f32 %v3516_v20, %v1166_v3 }
 0x1eb   : > { %1324 = vst [vmem:[#allocation2 + $0x19] sm:$0xff] %v1292_v57  ;;  %v1293_v53 = vmax.f32 %v1175_v10, 0.0 }
 0x1ec   : > { %1322 = vst [vmem:[#allocation2 + $0x1] sm:$0xff] %v1290_v63  ;;  %v1291_v23 = vmax.f32 %v1167_v50, 0.0 }
 0x1ed   : > { %1325 = vst [vmem:[#allocation2 + $0x21] sm:$0xff] %v1293_v53  ;;  %v1454_v1 = vpack.c.bf16 %v1293_v53, %v1292_v57 }
 0x1ee   : > { %1323 = vst [vmem:[#allocation2 + $0x9] sm:$0xff] %v1291_v23  ;;  %v1451_v9 = vpack.c.bf16 %v1291_v23, %v1290_v63  ;;  %v3075_v63 = vld [vmem:[%s3690_s5 + $0x18] sm:$0xff]  }
 0x1f0   : > { %1722 = vmatprep.mubr.bf16.mxu0 %v1451_v9 }
 0x1f2   : > { %v1356_v0 = vld [vmem:[#allocation2 + $0x18] sm:$0xff] }
 0x1f3   : > { %v1354_v55 = vld [vmem:[#allocation2] sm:$0xff] }
 0x1f4   : > { %v1420_v51 = vld [vmem:[#allocation2 + $0x1a] sm:$0xff]  ;;  %v1421_v52 = vld [vmem:[#allocation2 + $0x22] sm:$0xff] }
 0x1f5   : > { %v1418_v59 = vld [vmem:[#allocation2 + $0x2] sm:$0xff]  ;;  %v1419_v54 = vld [vmem:[#allocation2 + $0xa] sm:$0xff]  ;;  %v1455_v12 = vpack.c.bf16 %v1421_v52, %v1420_v51 }
 0x1f6   : > { %v1355_v60 = vld [vmem:[#allocation2 + $0x8] sm:$0xff]  ;;  %v2885_v61 = vpop.f32.mrb[36].mxu1  ;;  %v1452_v4 = vpack.c.bf16 %v1419_v54, %v1418_v59  ;;  %v1357_v58 = vld [vmem:[#allocation2 + $0x20] sm:$0xff] }
 0x1f7   : > { %v1450_v7 = vpack.c.bf16 %v1355_v60, %v1354_v55  ;;  %v1188_v2 = vadd.f32 %v2885_v61, %v3516_v20  ;;  %v1179_v6 = vpop.f32.mrb[37].mxu1  ;;  %v1453_v10 = vpack.c.bf16 %v1357_v58, %v1356_v0 }
 0x1f8   : > { %v1180_v13 = vadd.f32 %v3516_v20, %v1179_v6  ;;  %v2886_v8 = vpop.f32.mrb[38].mxu1  ;;  %2927 = vmatprep.mubr.bf16.mxu1 %v1452_v4 }
 0x1f9   : > { %1723 = vmatmul.mubr.bf16.vlgmr.msra.gmra.mrb[64].mxu0 %v1450_v7  ;;  %v1296_v15 = vmax.f32 %v1188_v2, 0.0  ;;  %v1191_v27 = vadd.f32 %v2886_v8, %v3516_v20  ;;  %v1182_v28 = vpop.f32.mrb[39].mxu1  ;;  %2928 = vmatmul.mubr.bf16.vlgmr.msra.gmra.mrb[64].mxu1 %v1455_v12 }
 0x1fa   : > { %1730 = vmatprep.mubr.bf16.mxu0 %v1454_v1  ;;  %v1294_v62 = vmax.f32 %v1180_v13, 0.0  ;;  %v1183_v5 = vadd.f32 %v3516_v20, %v1182_v28  ;;  %2960 = vmatpush3.bf16.msra.mxu1 %v3072_v22 }
 0x1fb   : > { %1328 = vst [vmem:[#allocation2 + $0x49] sm:$0xff] %v1296_v15  ;;  %v1297_v11 = vmax.f32 %v1191_v27, 0.0  ;;  %2961 = vmatprep.subr.bf16.mxu1 %v3073_v56 }
 0x1fc   : > { %1326 = vst [vmem:[#allocation2 + $0x31] sm:$0xff] %v1294_v62  ;;  %v1295_v14 = vmax.f32 %v1183_v5, 0.0 }
 0x1fd   : > { %1329 = vst [vmem:[#allocation2 + $0x51] sm:$0xff] %v1297_v11  ;;  %v1460_v57 = vpack.c.bf16 %v1297_v11, %v1296_v15 }
 0x1fe   : > { %1327 = vst [vmem:[#allocation2 + $0x39] sm:$0xff] %v1295_v14  ;;  %v1457_v3 = vpack.c.bf16 %v1295_v14, %v1294_v62  ;;  %2962 = vmatpush3.bf16.msra.mxu1 %v3073_v56 }
 0x1ff   : > { %2963 = vmatprep.subr.bf16.mxu1 %v3074_v16 }
 0x201   : > { %1731 = vmatmul.mubr.bf16.gmra.mrb[68].mxu0 %v1453_v10 }
 0x202   : > { %1738 = vmatprep.mubr.bf16.mxu0 %v1457_v3  ;;  %2964 = vmatpush3.bf16.msra.mxu1 %v3074_v16  ;;  %v1360_v27 = vld [vmem:[#allocation2 + $0x48] sm:$0xff] }
 0x203   : > { %2965 = vmatprep.subr.bf16.mxu1 %v3075_v63  ;;  %v1358_v50 = vld [vmem:[#allocation2 + $0x30] sm:$0xff] }
 0x204   : > { %v1424_v53 = vld [vmem:[#allocation2 + $0x4a] sm:$0xff]  ;;  %v1425_v23 = vld [vmem:[#allocation2 + $0x52] sm:$0xff] }
 0x205   : > { %v1422_v1 = vld [vmem:[#allocation2 + $0x32] sm:$0xff]  ;;  %v1423_v9 = vld [vmem:[#allocation2 + $0x3a] sm:$0xff]  ;;  %v1461_v60 = vpack.c.bf16 %v1425_v23, %v1424_v53 }
 0x206   : > { %v1359_v22 = vld [vmem:[#allocation2 + $0x38] sm:$0xff]  ;;  %v2889_v55 = vpop.f32.mrb[40].mxu1  ;;  %v1458_v51 = vpack.c.bf16 %v1423_v9, %v1422_v1  ;;  %2966 = vmatpush3.bf16.msra.mxu1 %v3075_v63  ;;  %v1361_v8 = vld [vmem:[#allocation2 + $0x50] sm:$0xff] }
 0x207   : > { %v1456_v52 = vpack.c.bf16 %v1359_v22, %v1358_v50  ;;  %v1204_v59 = vadd.f32 %v2889_v55, %v3516_v20  ;;  %v1195_v54 = vpop.f32.mrb[41].mxu1  ;;  %v1459_v62 = vpack.c.bf16 %v1361_v8, %v1360_v27 }
 0x208   : > { %v1196_v61 = vadd.f32 %v3516_v20, %v1195_v54  ;;  %v2890_v4 = vpop.f32.mrb[42].mxu1  ;;  %2931 = vmatprep.mubr.bf16.mxu1 %v1458_v51 }
 0x209   : > { %1739 = vmatmul.mubr.bf16.gmra.mrb[72].mxu0 %v1456_v52  ;;  %v1300_v7 = vmax.f32 %v1204_v59, 0.0  ;;  %v1207_v2 = vadd.f32 %v2890_v4, %v3516_v20  ;;  %v1198_v6 = vpop.f32.mrb[43].mxu1  ;;  %2932 = vmatmul.mubr.bf16.gmra.mrb[68].mxu1 %v1461_v60 }
 0x20a   : > { %1746 = vmatprep.mubr.bf16.mxu0 %v1460_v57  ;;  %v1298_v12 = vmax.f32 %v1196_v61, 0.0  ;;  %v1199_v56 = vadd.f32 %v3516_v20, %v1198_v6 }
 0x20b   : > { %1332 = vst [vmem:[#allocation2 + $0x79] sm:$0xff] %v1300_v7  ;;  %v1301_v13 = vmax.f32 %v1207_v2, 0.0 }
 0x20c   : > { %1330 = vst [vmem:[#allocation2 + $0x61] sm:$0xff] %v1298_v12  ;;  %v1299_v15 = vmax.f32 %v1199_v56, 0.0 }
 0x20d   : > { %1333 = vst [vmem:[#allocation2 + $0x81] sm:$0xff] %v1301_v13  ;;  %v1466_v28 = vpack.c.bf16 %v1301_v13, %v1300_v7 }
 0x20e   : > { %1331 = vst [vmem:[#allocation2 + $0x69] sm:$0xff] %v1299_v15  ;;  %v1463_v5 = vpack.c.bf16 %v1299_v15, %v1298_v12 }
 0x211   : > { %1747 = vmatmul.mubr.bf16.gmra.mrb[76].mxu0 %v1459_v62 }
 0x212   : > { %1754 = vmatprep.mubr.bf16.mxu0 %v1463_v5  ;;  %v1364_v4 = vld [vmem:[#allocation2 + $0x78] sm:$0xff] }
 0x213   : > { %v1362_v11 = vld [vmem:[#allocation2 + $0x60] sm:$0xff] }
 0x214   : > { %v1428_v58 = vld [vmem:[#allocation2 + $0x7a] sm:$0xff]  ;;  %v1429_v16 = vld [vmem:[#allocation2 + $0x82] sm:$0xff] }
 0x215   : > { %v1426_v14 = vld [vmem:[#allocation2 + $0x62] sm:$0xff]  ;;  %v1427_v0 = vld [vmem:[#allocation2 + $0x6a] sm:$0xff]  ;;  %v1467_v23 = vpack.c.bf16 %v1429_v16, %v1428_v58 }
 0x216   : > { %v1363_v57 = vld [vmem:[#allocation2 + $0x68] sm:$0xff]  ;;  %v2893_v10 = vpop.f32.mrb[44].mxu1  ;;  %v1464_v3 = vpack.c.bf16 %v1427_v0, %v1426_v14  ;;  %v1365_v60 = vld [vmem:[#allocation2 + $0x80] sm:$0xff] }
 0x217   : > { %v1462_v63 = vpack.c.bf16 %v1363_v57, %v1362_v11  ;;  %v1220_v50 = vadd.f32 %v2893_v10, %v3516_v20  ;;  %v1211_v53 = vpop.f32.mrb[45].mxu1  ;;  %v1465_v2 = vpack.c.bf16 %v1365_v60, %v1364_v4 }
 0x218   : > { %v1212_v1 = vadd.f32 %v3516_v20, %v1211_v53  ;;  %v2894_v9 = vpop.f32.mrb[46].mxu1  ;;  %2935 = vmatprep.mubr.bf16.mxu1 %v1464_v3 }
 0x219   : > { %1755 = vmatmul.mubr.bf16.gmra.mrb[80].mxu0 %v1462_v63  ;;  %v1304_v22 = vmax.f32 %v1220_v50, 0.0  ;;  %v1223_v55 = vadd.f32 %v2894_v9, %v3516_v20  ;;  %v1214_v51 = vpop.f32.mrb[47].mxu1  ;;  %2936 = vmatmul.mubr.bf16.gmra.mrb[72].mxu1 %v1467_v23 }
 0x21a   : > { %1762 = vmatprep.mubr.bf16.mxu0 %v1466_v28  ;;  %v1302_v52 = vmax.f32 %v1212_v1, 0.0  ;;  %v1215_v59 = vadd.f32 %v3516_v20, %v1214_v51 }
 0x21b   : > { %1336 = vst [vmem:[#allocation2 + $0xa9] sm:$0xff] %v1304_v22  ;;  %v1305_v54 = vmax.f32 %v1223_v55, 0.0 }
 0x21c   : > { %1334 = vst [vmem:[#allocation2 + $0x91] sm:$0xff] %v1302_v52  ;;  %v1303_v61 = vmax.f32 %v1215_v59, 0.0 }
 0x21d   : > { %1337 = vst [vmem:[#allocation2 + $0xb1] sm:$0xff] %v1305_v54  ;;  %v1472_v7 = vpack.c.bf16 %v1305_v54, %v1304_v22 }
 0x21e   : > { %1335 = vst [vmem:[#allocation2 + $0x99] sm:$0xff] %v1303_v61  ;;  %v1469_v6 = vpack.c.bf16 %v1303_v61, %v1302_v52 }
 0x221   : > { %1763 = vmatmul.mubr.bf16.gmra.mrb[84].mxu0 %v1465_v2 }
 0x222   : > { %1770 = vmatprep.mubr.bf16.mxu0 %v1469_v6  ;;  %v1368_v9 = vld [vmem:[#allocation2 + $0xa8] sm:$0xff] }
 0x223   : > { %v1366_v12 = vld [vmem:[#allocation2 + $0x90] sm:$0xff] }
 0x224   : > { %v1432_v56 = vld [vmem:[#allocation2 + $0xaa] sm:$0xff]  ;;  %v1433_v13 = vld [vmem:[#allocation2 + $0xb2] sm:$0xff] }
 0x225   : > { %v1430_v8 = vld [vmem:[#allocation2 + $0x92] sm:$0xff]  ;;  %v1431_v15 = vld [vmem:[#allocation2 + $0x9a] sm:$0xff]  ;;  %v1473_v16 = vpack.c.bf16 %v1433_v13, %v1432_v56 }
 0x226   : > { %v1367_v27 = vld [vmem:[#allocation2 + $0x98] sm:$0xff]  ;;  %v2897_v28 = vpop.f32.mrb[48].mxu1  ;;  %v1470_v62 = vpack.c.bf16 %v1431_v15, %v1430_v8  ;;  %v1369_v23 = vld [vmem:[#allocation2 + $0xb0] sm:$0xff] }
 0x227   : > { %v1468_v5 = vpack.c.bf16 %v1367_v27, %v1366_v12  ;;  %v1236_v11 = vadd.f32 %v2897_v28, %v3516_v20  ;;  %v1227_v58 = vpop.f32.mrb[49].mxu1  ;;  %v1471_v55 = vpack.c.bf16 %v1369_v23, %v1368_v9 }
 0x228   : > { %v1228_v14 = vadd.f32 %v3516_v20, %v1227_v58  ;;  %v2898_v0 = vpop.f32.mrb[50].mxu1  ;;  %2939 = vmatprep.mubr.bf16.mxu1 %v1470_v62 }
 0x229   : > { %1771 = vmatmul.mubr.bf16.gmra.mrb[88].mxu0 %v1468_v5  ;;  %v1308_v57 = vmax.f32 %v1236_v11, 0.0  ;;  %v1239_v10 = vadd.f32 %v2898_v0, %v3516_v20  ;;  %v1230_v3 = vpop.f32.mrb[51].mxu1  ;;  %2940 = vmatmul.mubr.bf16.gmra.mrb[76].mxu1 %v1473_v16 }
 0x22a   : > { %1778 = vmatprep.mubr.bf16.mxu0 %v1472_v7  ;;  %v1306_v63 = vmax.f32 %v1228_v14, 0.0  ;;  %v1231_v50 = vadd.f32 %v3516_v20, %v1230_v3 }
 0x22b   : > { %1340 = vst [vmem:[#allocation2 + $0xd9] sm:$0xff] %v1308_v57  ;;  %v1309_v53 = vmax.f32 %v1239_v10, 0.0 }
 0x22c   : > { %1338 = vst [vmem:[#allocation2 + $0xc1] sm:$0xff] %v1306_v63  ;;  %v1307_v1 = vmax.f32 %v1231_v50, 0.0 }
 0x22d   : > { %1341 = vst [vmem:[#allocation2 + $0xe1] sm:$0xff] %v1309_v53  ;;  %v1478_v22 = vpack.c.bf16 %v1309_v53, %v1308_v57 }
 0x22e   : > { %1339 = vst [vmem:[#allocation2 + $0xc9] sm:$0xff] %v1307_v1  ;;  %v1475_v51 = vpack.c.bf16 %v1307_v1, %v1306_v63 }
 0x231   : > { %1779 = vmatmul.mubr.bf16.gmra.mrb[92].mxu0 %v1471_v55 }
 0x232   : > { %1786 = vmatprep.mubr.bf16.mxu0 %v1475_v51  ;;  %v1372_v0 = vld [vmem:[#allocation2 + $0xd8] sm:$0xff] }
 0x233   : > { %v1370_v52 = vld [vmem:[#allocation2 + $0xc0] sm:$0xff] }
 0x234   : > { %v1436_v59 = vld [vmem:[#allocation2 + $0xda] sm:$0xff]  ;;  %v1437_v54 = vld [vmem:[#allocation2 + $0xe2] sm:$0xff] }
 0x235   : > { %v1434_v60 = vld [vmem:[#allocation2 + $0xc2] sm:$0xff]  ;;  %v1435_v61 = vld [vmem:[#allocation2 + $0xca] sm:$0xff]  ;;  %v1479_v13 = vpack.c.bf16 %v1437_v54, %v1436_v59 }
 0x236   : > { %v1371_v4 = vld [vmem:[#allocation2 + $0xc8] sm:$0xff]  ;;  %v2901_v7 = vpop.f32.mrb[52].mxu1  ;;  %v1476_v2 = vpack.c.bf16 %v1435_v61, %v1434_v60  ;;  %v1373_v16 = vld [vmem:[#allocation2 + $0xe0] sm:$0xff] }
 0x237   : > { %v1474_v6 = vpack.c.bf16 %v1371_v4, %v1370_v52  ;;  %v1252_v12 = vadd.f32 %v2901_v7, %v3516_v20  ;;  %v1243_v56 = vpop.f32.mrb[53].mxu1  ;;  %v1477_v10 = vpack.c.bf16 %v1373_v16, %v1372_v0 }
 0x238   : > { %v1244_v8 = vadd.f32 %v3516_v20, %v1243_v56  ;;  %v2902_v15 = vpop.f32.mrb[54].mxu1  ;;  %2943 = vmatprep.mubr.bf16.mxu1 %v1476_v2 }
 0x239   : > { %1787 = vmatmul.mubr.bf16.gmra.mrb[96].mxu0 %v1474_v6  ;;  %v1312_v27 = vmax.f32 %v1252_v12, 0.0  ;;  %v1255_v28 = vadd.f32 %v2902_v15, %v3516_v20  ;;  %v1246_v62 = vpop.f32.mrb[55].mxu1  ;;  %2944 = vmatmul.mubr.bf16.gmra.mrb[80].mxu1 %v1479_v13 }
 0x23a   : > { %1794 = vmatprep.mubr.bf16.mxu0 %v1478_v22  ;;  %v1310_v5 = vmax.f32 %v1244_v8, 0.0  ;;  %v1247_v11 = vadd.f32 %v3516_v20, %v1246_v62  ;;  %v3076_v8 = vld [vmem:[%s3690_s5 + $0x20] sm:$0xff]  }
 0x23b   : > { %1344 = vst [vmem:[#allocation2 + $0x109] sm:$0xff] %v1312_v27  ;;  %v1313_v58 = vmax.f32 %v1255_v28, 0.0  ;;  %2967 = vmatprep.subr.bf16.mxu1 %v3076_v8 }
 0x23c   : > { %1342 = vst [vmem:[#allocation2 + $0xf1] sm:$0xff] %v1310_v5  ;;  %v1311_v14 = vmax.f32 %v1247_v11, 0.0  ;;  %2968 = vmatpush3.bf16.msra.mxu1 %v3076_v8  ;;  %v3077_v11 = vld [vmem:[%s3690_s5 + $0x28] sm:$0xff]  }
 0x23d   : > { %1345 = vst [vmem:[#allocation2 + $0x111] sm:$0xff] %v1313_v58  ;;  %v1484_v57 = vpack.c.bf16 %v1313_v58, %v1312_v27  ;;  %2969 = vmatprep.subr.bf16.mxu1 %v3077_v11  ;;  %v3078_v58 = vld [vmem:[%s3690_s5 + $0x30] sm:$0xff]  }
 0x23e   : > { %1343 = vst [vmem:[#allocation2 + $0xf9] sm:$0xff] %v1311_v14  ;;  %v1481_v3 = vpack.c.bf16 %v1311_v14, %v1310_v5 }
 0x240   : > { %2970 = vmatpush3.bf16.msra.mxu1 %v3077_v11 }
 0x241   : > { %1795 = vmatmul.mubr.bf16.gmra.mrb[100].mxu0 %v1477_v10  ;;  %2971 = vmatprep.subr.bf16.mxu1 %v3078_v58 }
 0x242   : > { %1802 = vmatprep.mubr.bf16.mxu0 %v1481_v3  ;;  %v1376_v27 = vld [vmem:[#allocation2 + $0x108] sm:$0xff] }
 0x243   : > { %v1374_v63 = vld [vmem:[#allocation2 + $0xf0] sm:$0xff] }
 0x244   : > { %v1440_v50 = vld [vmem:[#allocation2 + $0x10a] sm:$0xff]  ;;  %v1441_v53 = vld [vmem:[#allocation2 + $0x112] sm:$0xff]  ;;  %2972 = vmatpush3.bf16.msra.mxu1 %v3078_v58 }
 0x245   : > { %v1438_v23 = vld [vmem:[#allocation2 + $0xf2] sm:$0xff]  ;;  %v1439_v1 = vld [vmem:[#allocation2 + $0xfa] sm:$0xff]  ;;  %v1485_v54 = vpack.c.bf16 %v1441_v53, %v1440_v50 }
 0x246   : > { %v1375_v9 = vld [vmem:[#allocation2 + $0xf8] sm:$0xff]  ;;  %v2905_v22 = vpop.f32.mrb[56].mxu1  ;;  %v1482_v55 = vpack.c.bf16 %v1439_v1, %v1438_v23  ;;  %v1377_v13 = vld [vmem:[#allocation2 + $0x110] sm:$0xff] }
 0x247   : > { %v1480_v51 = vpack.c.bf16 %v1375_v9, %v1374_v63  ;;  %v1268_v52 = vadd.f32 %v2905_v22, %v3516_v20  ;;  %v1259_v59 = vpop.f32.mrb[57].mxu1  ;;  %v1483_v62 = vpack.c.bf16 %v1377_v13, %v1376_v27  ;;  %v3079_v22 = vld [vmem:[%s3690_s5 + $0x38] sm:$0xff]  }
 0x248   : > { %v1260_v60 = vadd.f32 %v3516_v20, %v1259_v59  ;;  %v2906_v61 = vpop.f32.mrb[58].mxu1  ;;  %2947 = vmatprep.mubr.bf16.mxu1 %v1482_v55  ;;  %2973 = vmatprep.subr.bf16.mxu1 %v3079_v22 }
 0x249   : > { %1803 = vmatmul.mubr.bf16.gmra.mrb[104].mxu0 %v1480_v51  ;;  %v1316_v4 = vmax.f32 %v1268_v52, 0.0  ;;  %v1271_v7 = vadd.f32 %v2906_v61, %v3516_v20  ;;  %v1262_v2 = vpop.f32.mrb[59].mxu1  ;;  %2948 = vmatmul.mubr.bf16.gmra.mrb[84].mxu1 %v1485_v54 }
 0x24a   : > { %1810 = vmatprep.mubr.bf16.mxu0 %v1484_v57  ;;  %v1314_v6 = vmax.f32 %v1260_v60, 0.0  ;;  %v1263_v12 = vadd.f32 %v3516_v20, %v1262_v2  ;;  %2974 = vmatpush3.bf16.msra.mxu1 %v3079_v22 }
 0x24b   : > { %1348 = vst [vmem:[#allocation2 + $0x139] sm:$0xff] %v1316_v4  ;;  %v1317_v56 = vmax.f32 %v1271_v7, 0.0 }
 0x24c   : > { %1346 = vst [vmem:[#allocation2 + $0x121] sm:$0xff] %v1314_v6  ;;  %v1315_v15 = vmax.f32 %v1263_v12, 0.0 }
 0x24d   : > { %1349 = vst [vmem:[#allocation2 + $0x141] sm:$0xff] %v1317_v56  ;;  %v1490_v28 = vpack.c.bf16 %v1317_v56, %v1316_v4 }
 0x24e   : > { %1347 = vst [vmem:[#allocation2 + $0x129] sm:$0xff] %v1315_v15  ;;  %v1487_v5 = vpack.c.bf16 %v1315_v15, %v1314_v6 }
 0x251   : > { %1811 = vmatmul.mubr.bf16.gmra.mrb[108].mxu0 %v1483_v62 }
 0x252   : > { %1818 = vmatprep.mubr.bf16.mxu0 %v1487_v5  ;;  %v1380_v6 = vld [vmem:[#allocation2 + $0x138] sm:$0xff] }
 0x253   : > { %v1378_v16 = vld [vmem:[#allocation2 + $0x120] sm:$0xff] }
 0x254   : > { %v1444_v14 = vld [vmem:[#allocation2 + $0x13a] sm:$0xff]  ;;  %v1445_v0 = vld [vmem:[#allocation2 + $0x142] sm:$0xff] }
 0x255   : > { %v1442_v57 = vld [vmem:[#allocation2 + $0x122] sm:$0xff]  ;;  %v1443_v10 = vld [vmem:[#allocation2 + $0x12a] sm:$0xff]  ;;  %v1491_v9 = vpack.c.bf16 %v1445_v0, %v1444_v14 }
 0x256   : > { %v1379_v3 = vld [vmem:[#allocation2 + $0x128] sm:$0xff]  ;;  %v2909_v63 = vpop.f32.mrb[60].mxu1  ;;  %v1488_v50 = vpack.c.bf16 %v1443_v10, %v1442_v57  ;;  %v1381_v7 = vld [vmem:[#allocation2 + $0x140] sm:$0xff] }
 0x257   : > { %v1486_v53 = vpack.c.bf16 %v1379_v3, %v1378_v16  ;;  %v1284_v23 = vadd.f32 %v2909_v63, %v3516_v20  ;;  %v1275_v1 = vpop.f32.mrb[61].mxu1  ;;  %v1489_v56 = vpack.c.bf16 %v1381_v7, %v1380_v6 }
 0x258   : > { %v1276_v55 = vadd.f32 %v3516_v20, %v1275_v1  ;;  %v2910_v51 = vpop.f32.mrb[62].mxu1  ;;  %2951 = vmatprep.mubr.bf16.mxu1 %v1488_v50 }
 0x259   : > { %1819 = vmatmul.mubr.bf16.gmra.mrb[112].mxu0 %v1486_v53  ;;  %v1320_v52 = vmax.f32 %v1284_v23, 0.0  ;;  %v1287_v59 = vadd.f32 %v2910_v51, %v3516_v20  ;;  %v1278_v54 = vpop.f32.mrb[63].mxu1  ;;  %2952 = vmatmul.mubr.bf16.gmra.mrb[88].mxu1 %v1491_v9 }
 0x25a   : > { %1826 = vmatprep.mubr.bf16.mxu0 %v1490_v28  ;;  %v1318_v60 = vmax.f32 %v1276_v55, 0.0  ;;  %v1279_v61 = vadd.f32 %v3516_v20, %v1278_v54 }
 0x25b   : > { %1352 = vst [vmem:[#allocation2 + $0x169] sm:$0xff] %v1320_v52  ;;  %v1321_v4 = vmax.f32 %v1287_v59, 0.0 }
 0x25c   : > { %1350 = vst [vmem:[#allocation2 + $0x151] sm:$0xff] %v1318_v60  ;;  %v1319_v2 = vmax.f32 %v1279_v61, 0.0 }
 0x25d   : > { %1353 = vst [vmem:[#allocation2 + $0x171] sm:$0xff] %v1321_v4  ;;  %v1496_v12 = vpack.c.bf16 %v1321_v4, %v1320_v52 }
 0x25e   : > { %1351 = vst [vmem:[#allocation2 + $0x159] sm:$0xff] %v1319_v2  ;;  %v1493_v13 = vpack.c.bf16 %v1319_v2, %v1318_v60 }
 0x261   : > { %1827 = vmatmul.mubr.bf16.gmra.mrb[116].mxu0 %v1489_v56 }
 0x262   : > { %1834 = vmatprep.mubr.bf16.mxu0 %v1493_v13  ;;  %v1384_v14 = vld [vmem:[#allocation2 + $0x168] sm:$0xff] }
 0x263   : > { %v1382_v8 = vld [vmem:[#allocation2 + $0x150] sm:$0xff] }
 0x264   : > { %v1448_v15 = vld [vmem:[#allocation2 + $0x16a] sm:$0xff]  ;;  %v1449_v27 = vld [vmem:[#allocation2 + $0x172] sm:$0xff] }
 0x265   : > { %v1446_v28 = vld [vmem:[#allocation2 + $0x152] sm:$0xff]  ;;  %v1447_v20 = vld [vmem:[#allocation2 + $0x15a] sm:$0xff]  ;;  %v1497_v58 = vpack.c.bf16 %v1449_v27, %v1448_v15 }
 0x266   : > { %v1383_v62 = vld [vmem:[#allocation2 + $0x158] sm:$0xff]  ;;  %v1494_v5 = vpack.c.bf16 %v1447_v20, %v1446_v28  ;;  %v1385_v16 = vld [vmem:[#allocation2 + $0x170] sm:$0xff] }
 0x267   : > { %v1492_v11 = vpack.c.bf16 %v1383_v62, %v1382_v8  ;;  %v1495_v0 = vpack.c.bf16 %v1385_v16, %v1384_v14 }
 0x268   : > { %2955 = vmatprep.mubr.bf16.mxu1 %v1494_v5 }
 0x269   : > { %1835 = vmatmul.mubr.bf16.gmra.mrb[120].mxu0 %v1492_v11  ;;  %2956 = vmatmul.mubr.bf16.gmra.mrb[92].mxu1 %v1497_v58 }
 0x26a   : > { %1842 = vmatprep.mubr.bf16.mxu0 %v1496_v12 }
 0x271   : > { %1843 = vmatmul.mubr.bf16.gmra.mrb[124].mxu0 %v1495_v0 }
 0x2cc   : > { %v2671_v57 = vpop.f32.mrb[64].mxu0  ;;  %v2929_v10 = vpop.f32.mrb[64].mxu1 }
 0x2cd   : > { %v2672_v3 = vpop.f32.mrb[65].mxu0  ;;  %v1885_v50 = vpop.f32.mrb[65].mxu1 }
 0x2ce   : > { %v2673_v63 = vadd.f32 %v2672_v3, %v2671_v57  ;;  %v2674_v53 = vpop.f32.mrb[66].mxu0  ;;  %v2930_v23 = vpop.f32.mrb[66].mxu1 }
 0x2cf   : > { %v2675_v1 = vpop.f32.mrb[67].mxu0  ;;  %v1888_v55 = vpop.f32.mrb[67].mxu1 }
 0x2d0   : > { %v1886_v9 = vadd.f32 %v2673_v63, %v1885_v50  ;;  %v2676_v22 = vadd.f32 %v2675_v1, %v2674_v53 }
 0x2d2   : > { %v1889_v51 = vadd.f32 %v2676_v22, %v1888_v55 }
 0x2d4   : > { %v2012_v52 = vpack.c.bf16 %v1889_v51, %v1886_v9  ;;  %v2677_v59 = vpop.f32.mrb[68].mxu0 }
 0x2d5   : > { %v2678_v54 = vpop.f32.mrb[69].mxu0 }
 0x2d6   : > { %v2679_v60 = vadd.f32 %v2678_v54, %v2677_v59  ;;  %v2680_v61 = vpop.f32.mrb[70].mxu0  ;;  %2975 = vmatprep.mubr.bf16.mxu1 %v2012_v52 }
 0x2d7   : > { %v2681_v4 = vpop.f32.mrb[71].mxu0 }
 0x2d8   : > { %v1894_v7 = vadd.f32 %v2929_v10, %v2679_v60  ;;  %v2682_v2 = vadd.f32 %v2681_v4, %v2680_v61 }
 0x2da   : > { %v1897_v6 = vadd.f32 %v2930_v23, %v2682_v2 }
 0x2dc   : > { %v2013_v12 = vpack.c.bf16 %v1897_v6, %v1894_v7  ;;  %v2683_v56 = vpop.f32.mrb[72].mxu0  ;;  %v2933_v13 = vpop.f32.mrb[68].mxu1 }
 0x2dd   : > { %v2684_v8 = vpop.f32.mrb[73].mxu0  ;;  %v1901_v27 = vpop.f32.mrb[69].mxu1 }
 0x2de   : > { %v2685_v15 = vadd.f32 %v2684_v8, %v2683_v56  ;;  %v2686_v28 = vpop.f32.mrb[74].mxu0  ;;  %2976 = vmatmul.mubr.bf16.vlgmr.msra.gmra.mrb[96].mxu1 %v2013_v12  ;;  %v2934_v20 = vpop.f32.mrb[70].mxu1 }
 0x2df   : > { %v2687_v62 = vpop.f32.mrb[75].mxu0  ;;  %v1904_v58 = vpop.f32.mrb[71].mxu1 }
 0x2e0   : > { %v1902_v5 = vadd.f32 %v2685_v15, %v1901_v27  ;;  %v2688_v11 = vadd.f32 %v2687_v62, %v2686_v28 }
 0x2e2   : > { %v1905_v16 = vadd.f32 %v2688_v11, %v1904_v58 }
 0x2e4   : > { %v2014_v14 = vpack.c.bf16 %v1905_v16, %v1902_v5  ;;  %v2689_v0 = vpop.f32.mrb[76].mxu0 }
 0x2e5   : > { %v2690_v57 = vpop.f32.mrb[77].mxu0 }
 0x2e6   : > { %v2691_v10 = vadd.f32 %v2690_v57, %v2689_v0  ;;  %v2692_v3 = vpop.f32.mrb[78].mxu0  ;;  %2979 = vmatprep.mubr.bf16.mxu1 %v2014_v14 }
 0x2e7   : > { %v2693_v63 = vpop.f32.mrb[79].mxu0 }
 0x2e8   : > { %v1910_v50 = vadd.f32 %v2933_v13, %v2691_v10  ;;  %v2694_v53 = vadd.f32 %v2693_v63, %v2692_v3 }
 0x2ea   : > { %v1913_v23 = vadd.f32 %v2934_v20, %v2694_v53 }
 0x2ec   : > { %v2695_v1 = vpop.f32.mrb[80].mxu0  ;;  %v2015_v9 = vpack.c.bf16 %v1913_v23, %v1910_v50  ;;  %v2937_v22 = vpop.f32.mrb[72].mxu1 }
 0x2ed   : > { %v2696_v55 = vpop.f32.mrb[81].mxu0  ;;  %v1917_v52 = vpop.f32.mrb[73].mxu1 }
 0x2ee   : > { %v2697_v51 = vadd.f32 %v2696_v55, %v2695_v1  ;;  %v2698_v59 = vpop.f32.mrb[82].mxu0  ;;  %2980 = vmatmul.mubr.bf16.gmra.mrb[100].mxu1 %v2015_v9  ;;  %v2938_v54 = vpop.f32.mrb[74].mxu1 }
 0x2ef   : > { %v2699_v60 = vpop.f32.mrb[83].mxu0  ;;  %v1920_v7 = vpop.f32.mrb[75].mxu1 }
 0x2f0   : > { %v1918_v61 = vadd.f32 %v2697_v51, %v1917_v52  ;;  %v2700_v4 = vadd.f32 %v2699_v60, %v2698_v59 }
 0x2f2   : > { %v1921_v2 = vadd.f32 %v2700_v4, %v1920_v7 }
 0x2f4   : > { %v2016_v6 = vpack.c.bf16 %v1921_v2, %v1918_v61  ;;  %v2701_v12 = vpop.f32.mrb[84].mxu0 }
 0x2f5   : > { %v2702_v56 = vpop.f32.mrb[85].mxu0 }
 0x2f6   : > { %v2703_v13 = vadd.f32 %v2702_v56, %v2701_v12  ;;  %v2704_v8 = vpop.f32.mrb[86].mxu0  ;;  %2983 = vmatprep.mubr.bf16.mxu1 %v2016_v6 }
 0x2f7   : > { %v2705_v15 = vpop.f32.mrb[87].mxu0 }
 0x2f8   : > { %v1926_v27 = vadd.f32 %v2937_v22, %v2703_v13  ;;  %v2706_v28 = vadd.f32 %v2705_v15, %v2704_v8 }
 0x2fa   : > { %v1929_v20 = vadd.f32 %v2938_v54, %v2706_v28 }
 0x2fc   : > { %v2707_v62 = vpop.f32.mrb[88].mxu0  ;;  %v2017_v5 = vpack.c.bf16 %v1929_v20, %v1926_v27  ;;  %v2941_v11 = vpop.f32.mrb[76].mxu1 }
 0x2fd   : > { %v2708_v58 = vpop.f32.mrb[89].mxu0  ;;  %v1933_v14 = vpop.f32.mrb[77].mxu1 }
 0x2fe   : > { %v2709_v16 = vadd.f32 %v2708_v58, %v2707_v62  ;;  %v2710_v0 = vpop.f32.mrb[90].mxu0  ;;  %2984 = vmatmul.mubr.bf16.gmra.mrb[104].mxu1 %v2017_v5  ;;  %v2942_v57 = vpop.f32.mrb[78].mxu1 }
 0x2ff   : > { %v2711_v10 = vpop.f32.mrb[91].mxu0  ;;  %v1936_v50 = vpop.f32.mrb[79].mxu1 }
 0x300   : > { %v1934_v3 = vadd.f32 %v2709_v16, %v1933_v14  ;;  %v2712_v63 = vadd.f32 %v2711_v10, %v2710_v0 }
 0x302   : > { %v1937_v53 = vadd.f32 %v2712_v63, %v1936_v50 }
 0x304   : > { %v2018_v23 = vpack.c.bf16 %v1937_v53, %v1934_v3  ;;  %v2713_v1 = vpop.f32.mrb[92].mxu0 }
 0x305   : > { %v2714_v9 = vpop.f32.mrb[93].mxu0 }
 0x306   : > { %v2715_v22 = vadd.f32 %v2714_v9, %v2713_v1  ;;  %v2716_v55 = vpop.f32.mrb[94].mxu0  ;;  %2987 = vmatprep.mubr.bf16.mxu1 %v2018_v23 }
 0x307   : > { %v2717_v51 = vpop.f32.mrb[95].mxu0 }
 0x308   : > { %v1942_v52 = vadd.f32 %v2941_v11, %v2715_v22  ;;  %v2718_v59 = vadd.f32 %v2717_v51, %v2716_v55 }
 0x30a   : > { %v1945_v54 = vadd.f32 %v2942_v57, %v2718_v59 }
 0x30c   : > { %v2719_v60 = vpop.f32.mrb[96].mxu0  ;;  %v2019_v61 = vpack.c.bf16 %v1945_v54, %v1942_v52  ;;  %v2945_v4 = vpop.f32.mrb[80].mxu1 }
 0x30d   : > { %v2720_v7 = vpop.f32.mrb[97].mxu0  ;;  %v1949_v6 = vpop.f32.mrb[81].mxu1 }
 0x30e   : > { %v2721_v2 = vadd.f32 %v2720_v7, %v2719_v60  ;;  %v2722_v12 = vpop.f32.mrb[98].mxu0  ;;  %2988 = vmatmul.mubr.bf16.gmra.mrb[108].mxu1 %v2019_v61  ;;  %v2946_v56 = vpop.f32.mrb[82].mxu1 }
 0x30f   : > { %v2723_v13 = vpop.f32.mrb[99].mxu0  ;;  %v1952_v27 = vpop.f32.mrb[83].mxu1 }
 0x310   : > { %v1950_v8 = vadd.f32 %v2721_v2, %v1949_v6  ;;  %v2724_v15 = vadd.f32 %v2723_v13, %v2722_v12 }
 0x312   : > { %v1953_v28 = vadd.f32 %v2724_v15, %v1952_v27 }
 0x314   : > { %v2020_v20 = vpack.c.bf16 %v1953_v28, %v1950_v8  ;;  %v2725_v62 = vpop.f32.mrb[100].mxu0 }
 0x315   : > { %v2726_v5 = vpop.f32.mrb[101].mxu0 }
 0x316   : > { %v2727_v11 = vadd.f32 %v2726_v5, %v2725_v62  ;;  %v2728_v58 = vpop.f32.mrb[102].mxu0  ;;  %2991 = vmatprep.mubr.bf16.mxu1 %v2020_v20 }
 0x317   : > { %v2729_v16 = vpop.f32.mrb[103].mxu0 }
 0x318   : > { %v1958_v14 = vadd.f32 %v2945_v4, %v2727_v11  ;;  %v2730_v0 = vadd.f32 %v2729_v16, %v2728_v58 }
 0x31a   : > { %v1961_v57 = vadd.f32 %v2946_v56, %v2730_v0 }
 0x31c   : > { %v2731_v10 = vpop.f32.mrb[104].mxu0  ;;  %v2021_v3 = vpack.c.bf16 %v1961_v57, %v1958_v14  ;;  %v2949_v63 = vpop.f32.mrb[84].mxu1 }
 0x31d   : > { %v2732_v50 = vpop.f32.mrb[105].mxu0  ;;  %v1965_v23 = vpop.f32.mrb[85].mxu1 }
 0x31e   : > { %v2733_v53 = vadd.f32 %v2732_v50, %v2731_v10  ;;  %v2734_v1 = vpop.f32.mrb[106].mxu0  ;;  %2992 = vmatmul.mubr.bf16.gmra.mrb[112].mxu1 %v2021_v3  ;;  %v2950_v9 = vpop.f32.mrb[86].mxu1 }
 0x31f   : > { %v2735_v22 = vpop.f32.mrb[107].mxu0  ;;  %v1968_v52 = vpop.f32.mrb[87].mxu1 }
 0x320   : > { %v1966_v55 = vadd.f32 %v2733_v53, %v1965_v23  ;;  %v2736_v51 = vadd.f32 %v2735_v22, %v2734_v1 }
 0x322   : > { %v1969_v59 = vadd.f32 %v2736_v51, %v1968_v52 }
 0x324   : > { %v2022_v54 = vpack.c.bf16 %v1969_v59, %v1966_v55  ;;  %v2737_v60 = vpop.f32.mrb[108].mxu0 }
 0x325   : > { %v2738_v61 = vpop.f32.mrb[109].mxu0 }
 0x326   : > { %v2739_v4 = vadd.f32 %v2738_v61, %v2737_v60  ;;  %v2740_v7 = vpop.f32.mrb[110].mxu0  ;;  %2995 = vmatprep.mubr.bf16.mxu1 %v2022_v54 }
 0x327   : > { %v2741_v2 = vpop.f32.mrb[111].mxu0 }
 0x328   : > { %v1974_v6 = vadd.f32 %v2949_v63, %v2739_v4  ;;  %v2742_v12 = vadd.f32 %v2741_v2, %v2740_v7 }
 0x32a   : > { %v1977_v56 = vadd.f32 %v2950_v9, %v2742_v12 }
 0x32c   : > { %v2743_v13 = vpop.f32.mrb[112].mxu0  ;;  %v2023_v8 = vpack.c.bf16 %v1977_v56, %v1974_v6  ;;  %v2953_v15 = vpop.f32.mrb[88].mxu1 }
 0x32d   : > { %v2744_v27 = vpop.f32.mrb[113].mxu0  ;;  %v1981_v20 = vpop.f32.mrb[89].mxu1 }
 0x32e   : > { %v2745_v28 = vadd.f32 %v2744_v27, %v2743_v13  ;;  %v2746_v62 = vpop.f32.mrb[114].mxu0  ;;  %2996 = vmatmul.mubr.bf16.gmra.mrb[116].mxu1 %v2023_v8  ;;  %v2954_v5 = vpop.f32.mrb[90].mxu1 }
 0x32f   : > { %v2747_v11 = vpop.f32.mrb[115].mxu0  ;;  %v1984_v14 = vpop.f32.mrb[91].mxu1 }
 0x330   : > { %v1982_v58 = vadd.f32 %v2745_v28, %v1981_v20  ;;  %v2748_v16 = vadd.f32 %v2747_v11, %v2746_v62 }
 0x332   : > { %v1985_v0 = vadd.f32 %v2748_v16, %v1984_v14 }
 0x334   : > { %v2024_v57 = vpack.c.bf16 %v1985_v0, %v1982_v58  ;;  %v2749_v10 = vpop.f32.mrb[116].mxu0  ;;  %v3577_v58 = vld [vmem:[%s3691_s6] ss:$0 sm:$0xff] }
 0x335   : > { %v2750_v3 = vpop.f32.mrb[117].mxu0 }
 0x336   : > { %v2751_v63 = vadd.f32 %v2750_v3, %v2749_v10  ;;  %v2752_v50 = vpop.f32.mrb[118].mxu0  ;;  %2999 = vmatprep.mubr.bf16.mxu1 %v2024_v57 }
 0x337   : > { %v2753_v53 = vpop.f32.mrb[119].mxu0 }
 0x338   : > { %v1990_v23 = vadd.f32 %v2953_v15, %v2751_v63  ;;  %v2754_v1 = vadd.f32 %v2753_v53, %v2752_v50 }
 0x33a   : > { %v1993_v9 = vadd.f32 %v2954_v5, %v2754_v1 }
 0x33c   : > { %v2755_v22 = vpop.f32.mrb[120].mxu0  ;;  %v2025_v55 = vpack.c.bf16 %v1993_v9, %v1990_v23  ;;  %v2957_v51 = vpop.f32.mrb[92].mxu1 }
 0x33d   : > { %v2756_v52 = vpop.f32.mrb[121].mxu0  ;;  %v1997_v54 = vpop.f32.mrb[93].mxu1 }
 0x33e   : > { %v2757_v59 = vadd.f32 %v2756_v52, %v2755_v22  ;;  %v2758_v60 = vpop.f32.mrb[122].mxu0  ;;  %3000 = vmatmul.mubr.bf16.gmra.mrb[120].mxu1 %v2025_v55  ;;  %v2958_v61 = vpop.f32.mrb[94].mxu1 }
 0x33f   : > { %v2759_v4 = vpop.f32.mrb[123].mxu0  ;;  %v2000_v6 = vpop.f32.mrb[95].mxu1 }
 0x340   : > { %v1998_v7 = vadd.f32 %v2757_v59, %v1997_v54  ;;  %v2760_v2 = vadd.f32 %v2759_v4, %v2758_v60 }
 0x342   : > { %v2001_v12 = vadd.f32 %v2760_v2, %v2000_v6 }
 0x344   : > { %v2026_v56 = vpack.c.bf16 %v2001_v12, %v1998_v7  ;;  %v2761_v13 = vpop.f32.mrb[124].mxu0 }
 0x345   : > { %v2762_v8 = vpop.f32.mrb[125].mxu0 }
 0x346   : > { %v2763_v15 = vadd.f32 %v2762_v8, %v2761_v13  ;;  %v2764_v27 = vpop.f32.mrb[126].mxu0  ;;  %3003 = vmatprep.mubr.bf16.mxu1 %v2026_v56 }
 0x347   : > { %v2765_v28 = vpop.f32.mrb[127].mxu0 }
 0x348   : > { %v2006_v20 = vadd.f32 %v2957_v51, %v2763_v15  ;;  %v2766_v62 = vadd.f32 %v2765_v28, %v2764_v27 }
 0x34a   : > { %v2009_v5 = vadd.f32 %v2958_v61, %v2766_v62 }
 0x34c   : > { %v2027_v11 = vpack.c.bf16 %v2009_v5, %v2006_v20 }
 0x34e   : > { %3004 = vmatmul.mubr.bf16.gmra.mrb[124].mxu1 %v2027_v11 }
 0x3b1   : > { %v2977_v16 = vpop.f32.mrb[96].mxu1 }
 0x3b2   : > { %v2142_v14 = vadd.f32 %v2977_v16, %v3577_v58  ;;  %v2133_v0 = vpop.f32.mrb[97].mxu1 }
 0x3b3   : > { %v2134_v57 = vadd.f32 %v3577_v58, %v2133_v0  ;;  %v2978_v10 = vpop.f32.mrb[98].mxu1 }
 0x3b4   : > { %v2262_v3 = vadd.f32 %v2142_v14, %v3225_v26  ;;  %v2145_v63 = vadd.f32 %v2978_v10, %v3577_v58  ;;  %v2136_v50 = vpop.f32.mrb[99].mxu1 }
 0x3b5   : > { %v2260_v53 = vadd.f32 %v2134_v57, %v3219_v24  ;;  %v2137_v23 = vadd.f32 %v3577_v58, %v2136_v50 }
 0x3b6   : > { %v2294_v1 = vmax.f32 %v2262_v3, 0.0  ;;  %v2263_v26 = vadd.f32 %v2145_v63, %v3235_v29 }
 0x3b7   : > { %v2292_v9 = vmax.f32 %v2260_v53, 0.0  ;;  %v2261_v22 = vadd.f32 %v2137_v23, %v3222_v25 }
 0x3b8   : > { %2326 = vst [vmem:[%s3588_s21 + $0x10] sm:$0xff] %v2294_v1  ;;  %v2295_v55 = vmax.f32 %v2263_v26, 0.0 }
 0x3b9   : > { %2324 = vst [vmem:[%s3588_s21] sm:$0xff] %v2292_v9  ;;  %v2293_v51 = vmax.f32 %v2261_v22, 0.0 }
 0x3ba   : > { %2327 = vst [vmem:[%s3588_s21 + $0x18] sm:$0xff] %v2295_v55 }
 0x3bb   : > { %2325 = vst [vmem:[%s3588_s21 + $0x8] sm:$0xff] %v2293_v51 }
 0x3c1   : > { %v2981_v52 = vpop.f32.mrb[100].mxu1 }
 0x3c2   : > { %v2158_v59 = vadd.f32 %v2981_v52, %v3577_v58  ;;  %v2149_v24 = vpop.f32.mrb[101].mxu1 }
 0x3c3   : > { %v2150_v54 = vadd.f32 %v3577_v58, %v2149_v24  ;;  %v2982_v29 = vpop.f32.mrb[102].mxu1 }
 0x3c4   : > { %v2266_v60 = vadd.f32 %v2158_v59, %v3248_v32  ;;  %v2161_v25 = vadd.f32 %v2982_v29, %v3577_v58  ;;  %v2152_v61 = vpop.f32.mrb[103].mxu1 }
 0x3c5   : > { %v2264_v4 = vadd.f32 %v2150_v54, %v3239_v30  ;;  %v2153_v7 = vadd.f32 %v3577_v58, %v2152_v61 }
 0x3c6   : > { %v2298_v2 = vmax.f32 %v2266_v60, 0.0  ;;  %v2267_v6 = vadd.f32 %v2161_v25, %v3251_v33 }
 0x3c7   : > { %v2296_v12 = vmax.f32 %v2264_v4, 0.0  ;;  %v2265_v56 = vadd.f32 %v2153_v7, %v3242_v31 }
 0x3c8   : > { %2330 = vst [vmem:[%s3588_s21 + $0x30] sm:$0xff] %v2298_v2  ;;  %v2299_v13 = vmax.f32 %v2267_v6, 0.0 }
 0x3c9   : > { %2328 = vst [vmem:[%s3588_s21 + $0x20] sm:$0xff] %v2296_v12  ;;  %v2297_v8 = vmax.f32 %v2265_v56, 0.0 }
 0x3ca   : > { %2331 = vst [vmem:[%s3588_s21 + $0x38] sm:$0xff] %v2299_v13 }
 0x3cb   : > { %2329 = vst [vmem:[%s3588_s21 + $0x28] sm:$0xff] %v2297_v8 }
 0x3d1   : > { %v2985_v32 = vpop.f32.mrb[104].mxu1 }
 0x3d2   : > { %v2174_v15 = vadd.f32 %v2985_v32, %v3577_v58  ;;  %v2165_v30 = vpop.f32.mrb[105].mxu1 }
 0x3d3   : > { %v2166_v27 = vadd.f32 %v3577_v58, %v2165_v30  ;;  %v2986_v33 = vpop.f32.mrb[106].mxu1 }
 0x3d4   : > { %v2270_v28 = vadd.f32 %v2174_v15, %v3263_v36  ;;  %v2177_v31 = vadd.f32 %v2986_v33, %v3577_v58  ;;  %v2168_v20 = vpop.f32.mrb[107].mxu1 }
 0x3d5   : > { %v2268_v62 = vadd.f32 %v2166_v27, %v3254_v34  ;;  %v2169_v5 = vadd.f32 %v3577_v58, %v2168_v20 }
 0x3d6   : > { %v2302_v11 = vmax.f32 %v2270_v28, 0.0  ;;  %v2271_v16 = vadd.f32 %v2177_v31, %v3266_v37 }
 0x3d7   : > { %v2300_v14 = vmax.f32 %v2268_v62, 0.0  ;;  %v2269_v0 = vadd.f32 %v2169_v5, %v3259_v35 }
 0x3d8   : > { %2334 = vst [vmem:[%s3588_s21 + $0x50] sm:$0xff] %v2302_v11  ;;  %v2303_v57 = vmax.f32 %v2271_v16, 0.0 }
 0x3d9   : > { %2332 = vst [vmem:[%s3588_s21 + $0x40] sm:$0xff] %v2300_v14  ;;  %v2301_v10 = vmax.f32 %v2269_v0, 0.0 }
 0x3da   : > { %2335 = vst [vmem:[%s3588_s21 + $0x58] sm:$0xff] %v2303_v57 }
 0x3db   : > { %2333 = vst [vmem:[%s3588_s21 + $0x48] sm:$0xff] %v2301_v10 }
 0x3e1   : > { %v2989_v36 = vpop.f32.mrb[108].mxu1 }
 0x3e2   : > { %v2190_v3 = vadd.f32 %v2989_v36, %v3577_v58  ;;  %v2181_v34 = vpop.f32.mrb[109].mxu1 }
 0x3e3   : > { %v2182_v63 = vadd.f32 %v3577_v58, %v2181_v34  ;;  %v2990_v37 = vpop.f32.mrb[110].mxu1 }
 0x3e4   : > { %v2274_v50 = vadd.f32 %v2190_v3, %v3278_v40  ;;  %v2193_v35 = vadd.f32 %v2990_v37, %v3577_v58  ;;  %v2184_v53 = vpop.f32.mrb[111].mxu1 }
 0x3e5   : > { %v2272_v23 = vadd.f32 %v2182_v63, %v3272_v38  ;;  %v2185_v1 = vadd.f32 %v3577_v58, %v2184_v53  ;;  %v3701_v53 = vld [vmem:[#allocation5_spill] sm:$0xff] }
 0x3e6   : > { %v2306_v26 = vmax.f32 %v2274_v50, 0.0  ;;  %v2275_v9 = vadd.f32 %v2193_v35, %v3283_v41 }
 0x3e7   : > { %v2304_v22 = vmax.f32 %v2272_v23, 0.0  ;;  %v2273_v55 = vadd.f32 %v2185_v1, %v3275_v39 }
 0x3e8   : > { %2338 = vst [vmem:[%s3588_s21 + $0x70] sm:$0xff] %v2306_v26  ;;  %v2307_v51 = vmax.f32 %v2275_v9, 0.0  ;;  %v3702_v26 = vld [vmem:[#allocation3_spill] sm:$0xff] }
 0x3e9   : > { %2336 = vst [vmem:[%s3588_s21 + $0x60] sm:$0xff] %v2304_v22  ;;  %v2305_v52 = vmax.f32 %v2273_v55, 0.0 }
 0x3ea   : > { %2339 = vst [vmem:[%s3588_s21 + $0x78] sm:$0xff] %v2307_v51  ;;  %v3703_v51 = vld [vmem:[#allocation6_spill] sm:$0xff] }
 0x3eb   : > { %2337 = vst [vmem:[%s3588_s21 + $0x68] sm:$0xff] %v2305_v52 }
 0x3f1   : > { %v2993_v40 = vpop.f32.mrb[112].mxu1 }
 0x3f2   : > { %v2206_v59 = vadd.f32 %v2993_v40, %v3577_v58  ;;  %v2197_v38 = vpop.f32.mrb[113].mxu1 }
 0x3f3   : > { %v2198_v24 = vadd.f32 %v3577_v58, %v2197_v38  ;;  %v2994_v41 = vpop.f32.mrb[114].mxu1 }
 0x3f4   : > { %v2278_v54 = vadd.f32 %v2206_v59, %v3296_v44  ;;  %v2209_v39 = vadd.f32 %v2994_v41, %v3577_v58  ;;  %v2200_v29 = vpop.f32.mrb[115].mxu1  ;;  %v3704_v59 = vld [vmem:[#allocation4_spill] sm:$0xff] }
 0x3f5   : > { %v2276_v60 = vadd.f32 %v2198_v24, %v3287_v42  ;;  %v2201_v25 = vadd.f32 %v3577_v58, %v2200_v29 }
 0x3f6   : > { %v2310_v61 = vmax.f32 %v2278_v54, 0.0  ;;  %v2279_v4 = vadd.f32 %v2209_v39, %v3299_v45 }
 0x3f7   : > { %v2308_v7 = vmax.f32 %v2276_v60, 0.0  ;;  %v2277_v2 = vadd.f32 %v2201_v25, %v3290_v43 }
 0x3f8   : > { %2342 = vst [vmem:[%s3588_s21 + $0x90] sm:$0xff] %v2310_v61  ;;  %v2311_v6 = vmax.f32 %v2279_v4, 0.0 }
 0x3f9   : > { %2340 = vst [vmem:[%s3588_s21 + $0x80] sm:$0xff] %v2308_v7  ;;  %v2309_v12 = vmax.f32 %v2277_v2, 0.0 }
 0x3fa   : > { %2343 = vst [vmem:[%s3588_s21 + $0x98] sm:$0xff] %v2311_v6 }
 0x3fb   : > { %2341 = vst [vmem:[%s3588_s21 + $0x88] sm:$0xff] %v2309_v12 }
 0x401   : > { %v2997_v44 = vpop.f32.mrb[116].mxu1 }
 0x402   : > { %v2222_v56 = vadd.f32 %v2997_v44, %v3577_v58  ;;  %v2213_v42 = vpop.f32.mrb[117].mxu1 }
 0x403   : > { %v2214_v13 = vadd.f32 %v3577_v58, %v2213_v42  ;;  %v2998_v45 = vpop.f32.mrb[118].mxu1 }
 0x404   : > { %v2282_v8 = vadd.f32 %v2222_v56, %v3311_v48  ;;  %v2225_v43 = vadd.f32 %v2998_v45, %v3577_v58  ;;  %v2216_v32 = vpop.f32.mrb[119].mxu1 }
 0x405   : > { %v2280_v15 = vadd.f32 %v2214_v13, %v3302_v46  ;;  %v2217_v30 = vadd.f32 %v3577_v58, %v2216_v32 }
 0x406   : > { %v2314_v27 = vmax.f32 %v2282_v8, 0.0  ;;  %v2283_v33 = vadd.f32 %v2225_v43, %v3314_v49 }
 0x407   : > { %v2312_v28 = vmax.f32 %v2280_v15, 0.0  ;;  %v2281_v31 = vadd.f32 %v2217_v30, %v3307_v47 }
 0x408   : > { %2346 = vst [vmem:[%s3588_s21 + $0xb0] sm:$0xff] %v2314_v27  ;;  %v2315_v20 = vmax.f32 %v2283_v33, 0.0 }
 0x409   : > { %2344 = vst [vmem:[%s3588_s21 + $0xa0] sm:$0xff] %v2312_v28  ;;  %v2313_v62 = vmax.f32 %v2281_v31, 0.0 }
 0x40a   : > { %2347 = vst [vmem:[%s3588_s21 + $0xb8] sm:$0xff] %v2315_v20 }
 0x40b   : > { %2345 = vst [vmem:[%s3588_s21 + $0xa8] sm:$0xff] %v2313_v62 }
 0x411   : > { %v3001_v48 = vpop.f32.mrb[120].mxu1 }
 0x412   : > { %v2238_v5 = vadd.f32 %v3001_v48, %v3577_v58  ;;  %v2229_v46 = vpop.f32.mrb[121].mxu1 }
 0x413   : > { %v2230_v11 = vadd.f32 %v3577_v58, %v2229_v46  ;;  %v3002_v49 = vpop.f32.mrb[122].mxu1 }
 0x414   : > { %v2286_v16 = vadd.f32 %v2238_v5, %v3332_v19  ;;  %v2241_v47 = vadd.f32 %v3002_v49, %v3577_v58  ;;  %v2232_v14 = vpop.f32.mrb[123].mxu1 }
 0x415   : > { %v2284_v0 = vadd.f32 %v2230_v11, %v3326_v17  ;;  %v2233_v57 = vadd.f32 %v3577_v58, %v2232_v14 }
 0x416   : > { %v2318_v10 = vmax.f32 %v2286_v16, 0.0  ;;  %v2287_v36 = vadd.f32 %v2241_v47, %v3337_v21 }
 0x417   : > { %v2316_v3 = vmax.f32 %v2284_v0, 0.0  ;;  %v2285_v34 = vadd.f32 %v2233_v57, %v3329_v18 }
 0x418   : > { %2350 = vst [vmem:[%s3588_s21 + $0xd0] sm:$0xff] %v2318_v10  ;;  %v2319_v63 = vmax.f32 %v2287_v36, 0.0 }
 0x419   : > { %2348 = vst [vmem:[%s3588_s21 + $0xc0] sm:$0xff] %v2316_v3  ;;  %v2317_v37 = vmax.f32 %v2285_v34, 0.0 }
 0x41a   : > { %2351 = vst [vmem:[%s3588_s21 + $0xd8] sm:$0xff] %v2319_v63 }
 0x41b   : > { %2349 = vst [vmem:[%s3588_s21 + $0xc8] sm:$0xff] %v2317_v37 }
 0x421   : > { %v3005_v19 = vpop.f32.mrb[124].mxu1 }
 0x422   : > { %v2254_v50 = vadd.f32 %v3005_v19, %v3577_v58  ;;  %v2245_v17 = vpop.f32.mrb[125].mxu1 }
 0x423   : > { %v2246_v35 = vadd.f32 %v3577_v58, %v2245_v17  ;;  %v3006_v21 = vpop.f32.mrb[126].mxu1 }
 0x424   : > { %v2290_v23 = vadd.f32 %v2254_v50, %v3701_v53  ;;  %v2257_v18 = vadd.f32 %v3006_v21, %v3577_v58  ;;  %v2248_v1 = vpop.f32.mrb[127].mxu1 }
 0x425   : > { %v2288_v9 = vadd.f32 %v2246_v35, %v3702_v26  ;;  %v2249_v22 = vadd.f32 %v3577_v58, %v2248_v1 }
 0x426   : > { %v2322_v55 = vmax.f32 %v2290_v23, 0.0  ;;  %v2291_v52 = vadd.f32 %v2257_v18, %v3703_v51 }
 0x427   : > { %v2320_v40 = vmax.f32 %v2288_v9, 0.0  ;;  %v2289_v38 = vadd.f32 %v2249_v22, %v3704_v59 }
 0x428   : > { %2354 = vst [vmem:[%s3588_s21 + $0xf0] sm:$0xff] %v2322_v55  ;;  %v2323_v24 = vmax.f32 %v2291_v52, 0.0 }
 0x429   : > { %2352 = vst [vmem:[%s3588_s21 + $0xe0] sm:$0xff] %v2320_v40  ;;  %v2321_v41 = vmax.f32 %v2289_v38, 0.0 }
 0x42a   : > { %2355 = vst [vmem:[%s3588_s21 + $0xf8] sm:$0xff] %v2323_v24 }
 0x42b   : > { %2353 = vst [vmem:[%s3588_s21 + $0xe8] sm:$0xff] %v2321_v41 }
 0x42c PF: > { %s17_s24 = sadd.s32 1, %s3086_s24  }
 0x42d   : > { %p14_p4 = scmp.ge.s32.totalorder %s17_s24, 4  }
 0x42f   :  { %16 = sbr.rel (!%p14_p4) target bundleno = 1 (0x1), region = 78 }

</bundles_post_ra>
